<compile_context>
chip_gen: v7x
topology: tpu7x:2x2x1
jax: 0.10.0
libtpu: 0.0.40
codegen_flags: <defaults>
</compile_context>

<pallas_src>
import jax
import jax.numpy as jnp
from jax.experimental import pallas as pl
from jax.experimental.pallas import tpu as pltpu

# Small, forward-consistent shapes.
N, C, H, W = 2, 4, 16, 16
HW = H * W
NHW = N * HW
LAYERS = 3
BN_EPS = 1e-5
CLAMP_LO, CLAMP_HI = 1e-4, 1.0

# Tap order t = ky*3 + kx  <->  spatial offset (dy, dx) = (ky-1, kx-1).
_TAP_OFFS = tuple((dy, dx) for dy in (-1, 0, 1) for dx in (-1, 0, 1))


# ----------------------------- kernel helpers -----------------------------
def _tap_stack(x):
    """Stack the 9 spatially shifted copies of x along the sublane axis.

    x: (rows, NHW) with flat index n*H*W + h*W + w.  A spatial offset (dy, dx)
    is a flat lane shift s = dy*W + dx, realized as an XLU rotation
    pltpu.roll(x, (-s) % NHW, axis=1).  Returns (9*rows, NHW), row t*rows + r
    holding tap t of x[r].  Wrapped lanes are out-of-image positions and must
    be zeroed by the caller via the tap masks (emulating zero padding).
    """
    parts = []
    for dy, dx in _TAP_OFFS:
        s = dy * W + dx
        if s == 0:
            parts.append(x)
        else:
            parts.append(pltpu.roll(x, shift=(-s) % NHW, axis=1))
    return jnp.concatenate(parts, axis=0)


# --------------------------------- kernel ---------------------------------
def enhance_kernel(x_ref, m1_ref, mC_ref,
                   w_in_ref, b_in_ref,
                   w_blk_ref, b_blk_ref, gamma_ref, beta_ref,
                   w_out_ref, b_out_ref, sob_ref,
                   w_up_ref, b_up_ref,
                   o_ref):
    x = x_ref[...]                      # (1, NHW) flattened input image(s)
    m1 = m1_ref[...]                    # (9, NHW)   per-tap masks, rows = taps
    mC = mC_ref[...]                    # (9*C, NHW) per-tap masks repeated per channel

    # ---- hoisted weight reads (read once, shared across the LAYERS loop) ----
    w_in = w_in_ref[...]                # (C, 9)
    b_in = b_in_ref[...]                # (C, 1)
    w_blk = w_blk_ref[...]              # (C, 9*C)   col = t*C + ci
    b_blk = b_blk_ref[...]              # (C, 1)
    gamma = gamma_ref[...]              # (C, 1)
    beta = beta_ref[...]                # (C, 1)
    w_out = w_out_ref[...]              # (1, 9*C)
    b_out = b_out_ref[...]              # (1, 1)
    sob = sob_ref[...]                  # (2, 9)     [sobel_x; sobel_y] taps
    wu = w_up_ref[0]                    # Conv1 (1x1 sobelconvup) weight, scalar
    bu = b_up_ref[0]                    # Conv1 bias, scalar

    # ---- input taps (shared by Sobelxy and in_conv), one masked stack ----
    xs = _tap_stack(x) * m1             # (9, NHW)

    # Sobelxy (3x3, zero pad) on the MXU; Conv1 (1x1) is a scalar FMA on top.
    g = jnp.dot(sob, xs, preferred_element_type=jnp.float32)      # (2, NHW)
    ga = jnp.abs(g)
    sobel_up = wu * (ga[0:1, :] + ga[1:2, :]) + bu                # (1, NHW)

    # in_conv: Conv2d(1 -> C, 3x3, pad 1) + ReLU as one stacked MXU dot.
    fea = jnp.maximum(
        jnp.dot(w_in, xs, preferred_element_type=jnp.float32) + b_in, 0.0)   # (C, NHW)

    # Residual blocks: fea += ReLU(BN(Conv(fea))); weights shared across layers.
    for _ in range(LAYERS):
        st = _tap_stack(fea) * mC                                  # (9*C, NHW)
        y = jnp.dot(w_blk, st, preferred_element_type=jnp.float32) + b_blk   # (C, NHW)
        # Training-mode BatchNorm over (N,H,W) == the lane axis, fused stats:
        # two independent lane reductions, var = E[y^2] - mu^2 (clamped >= 0).
        mu = jnp.mean(y, axis=1, keepdims=True)                    # (C, 1)
        ex2 = jnp.mean(y * y, axis=1, keepdims=True)               # (C, 1)
        var = jnp.maximum(ex2 - mu * mu, 0.0)
        z = gamma * ((y - mu) * jax.lax.rsqrt(var + BN_EPS)) + beta
        fea = fea + jnp.maximum(z, 0.0)

    # out_conv: Conv2d(C -> 1, 3x3, pad 1) + Sigmoid, one stacked MXU dot.
    st = _tap_stack(fea) * mC
    o = jnp.dot(w_out, st, preferred_element_type=jnp.float32) + b_out       # (1, NHW)
    illu = jax.nn.sigmoid(o) + x
    illu = sobel_up + illu
    o_ref[...] = jnp.clip(illu, CLAMP_LO, CLAMP_HI).astype(o_ref.dtype)


# ------------------------------- wrapper ----------------------------------
def _make_tap_masks():
    """(9, NHW) zero-padding validity masks and their (9*C, NHW) channel-repeat."""
    flat = jnp.arange(NHW, dtype=jnp.int32)
    hh = (flat // W) % H
    ww = flat % W
    rows = []
    for dy, dx in _TAP_OFFS:
        valid = (hh + dy >= 0) & (hh + dy < H) & (ww + dx >= 0) & (ww + dx < W)
        rows.append(valid.astype(jnp.float32))
    masks1 = jnp.stack(rows, axis=0)                       # (9, NHW)
    masksC = jnp.repeat(masks1, C, axis=0)                 # (9*C, NHW), tap-major
    return masks1, masksC


def prep_kernel_params(p):
    """One-time relayout of PyTorch-layout weights into stacked kernel layouts."""
    w_in = p['w_in'].reshape(C, 9)                                       # [co, t]
    b_in = p['b_in'].reshape(C, 1)
    # column index = t*C + ci  (tap-major, matching _tap_stack / masksC)
    w_blk = jnp.transpose(p['w_blk'], (0, 2, 3, 1)).reshape(C, 9 * C)    # [co, t*C+ci]
    b_blk = p['b_blk'].reshape(C, 1)
    gamma = p['gamma'].reshape(C, 1)
    beta = p['beta'].reshape(C, 1)
    w_out = jnp.transpose(p['w_out'], (0, 2, 3, 1)).reshape(1, 9 * C)    # [co, t*C+ci]
    b_out = p['b_out'].reshape(1, 1)
    sob = jnp.concatenate([p['w_sx'].reshape(1, 9), p['w_sy'].reshape(1, 9)], axis=0)
    w_up = p['w_up'].reshape(1)
    b_up = p['b_up'].reshape(1)
    return (w_in, b_in, w_blk, b_blk, gamma, beta, w_out, b_out, sob, w_up, b_up)


def enhance_forward(x, kparams, masks1, masksC):
    """x: (N, 1, H, W) float32. kparams: tuple from prep_kernel_params."""
    x_flat = x.reshape(1, NHW)                             # lane-dense input
    vmem = pl.BlockSpec(memory_space=pltpu.MemorySpace.VMEM)
    smem = pl.BlockSpec(memory_space=pltpu.MemorySpace.SMEM)
    out_flat = pl.pallas_call(
        enhance_kernel,
        out_shape=jax.ShapeDtypeStruct((1, NHW), jnp.float32),
        in_specs=[vmem] * 12 + [smem] * 2,                 # w_up/b_up scalars in SMEM
        out_specs=vmem,
    )(x_flat, masks1, masksC, *kparams)
    return out_flat.reshape(N, 1, H, W)


# ---------------- parameter construction (deterministic, in-script) ----------------
def make_params(key):
    ks = jax.random.split(key, 8)
    w_in = jax.random.uniform(ks[0], (C, 1, 3, 3), jnp.float32, -0.3, 0.3)
    b_in = jax.random.uniform(ks[1], (C,), jnp.float32, -0.1, 0.1)
    w_blk = jax.random.uniform(ks[2], (C, C, 3, 3), jnp.float32, -0.2, 0.2)
    b_blk = jax.random.uniform(ks[3], (C,), jnp.float32, -0.1, 0.1)
    gamma = jax.random.uniform(ks[4], (C,), jnp.float32, 0.5, 1.5)
    beta = jax.random.uniform(ks[5], (C,), jnp.float32, -0.1, 0.1)
    w_out = jax.random.uniform(ks[6], (1, C, 3, 3), jnp.float32, -0.3, 0.3)
    b_out = jax.random.uniform(ks[7], (1,), jnp.float32, -0.1, 0.1)
    sob = jnp.array([[1., 0., -1.], [2., 0., -2.], [1., 0., -1.]], jnp.float32)
    w_sx = sob.reshape(1, 1, 3, 3)
    w_sy = sob.T.reshape(1, 1, 3, 3)
    w_up = jnp.array(0.7, jnp.float32).reshape(1, 1, 1, 1)   # Conv1(1,1) 1x1 kernel
    b_up = jnp.array([0.05], jnp.float32)
    return dict(w_in=w_in, b_in=b_in, w_blk=w_blk, b_blk=b_blk, gamma=gamma,
                beta=beta, w_out=w_out, b_out=b_out, w_sx=w_sx, w_sy=w_sy,
                w_up=w_up, b_up=b_up)


# ---------------- pure-JAX reference (for correctness check) ----------------
def _conv2d_ref(x, w, b=None, pad=1):
    out = jax.lax.conv_general_dilated(
        x, w, (1, 1), ((pad, pad), (pad, pad)),
        dimension_numbers=('NCHW', 'OIHW', 'NCHW'))
    if b is not None:
        out = out + b[None, :, None, None]
    return out


def reference(x, p):
    sobel = jnp.abs(_conv2d_ref(x, p['w_sx'])) + jnp.abs(_conv2d_ref(x, p['w_sy']))
    fea = jax.nn.relu(_conv2d_ref(x, p['w_in'], p['b_in']))
    for _ in range(LAYERS):
        y = _conv2d_ref(fea, p['w_blk'], p['b_blk'])
        mu = jnp.mean(y, axis=(0, 2, 3), keepdims=True)
        var = jnp.mean((y - mu) ** 2, axis=(0, 2, 3), keepdims=True)
        yhat = (y - mu) / jnp.sqrt(var + BN_EPS)
        z = jax.nn.relu(p['gamma'][None, :, None, None] * yhat + p['beta'][None, :, None, None])
        fea = fea + z
    fea = jax.nn.sigmoid(_conv2d_ref(fea, p['w_out'], p['b_out']))
    illu = fea + x
    up = _conv2d_ref(sobel, p['w_up'], p['b_up'], pad=0)
    illu = up + illu
    return jnp.clip(illu, CLAMP_LO, CLAMP_HI)


if __name__ == "__main__":
    key = jax.random.PRNGKey(0)
    k_in, k_par = jax.random.split(key)
    x = jax.random.uniform(k_in, (N, 1, H, W), jnp.float32, 0.0, 1.0)

    params = make_params(k_par)
    kparams = prep_kernel_params(params)
    masks1, masksC = _make_tap_masks()

    out = enhance_forward(x, kparams, masks1, masksC)
    out = jax.block_until_ready(out)

    ref = reference(x, params)
    assert out.shape == (N, 1, H, W)
    max_err = float(jnp.max(jnp.abs(out - ref)))
    assert jnp.allclose(out, ref, atol=5e-5, rtol=5e-5), f"max abs err = {max_err}"

    print("KERNEL_OK")
</pallas_src>

<mosaic_0001>
module attributes {stable_mosaic.version = 11 : i64} {
  func.func @enhance_kernel(%arg0: memref<1x512xf32, #tpu.memory_space<vmem>>, %arg1: memref<9x512xf32, #tpu.memory_space<vmem>>, %arg2: memref<36x512xf32, #tpu.memory_space<vmem>>, %arg3: memref<4x9xf32, #tpu.memory_space<vmem>>, %arg4: memref<4x1xf32, #tpu.memory_space<vmem>>, %arg5: memref<4x36xf32, #tpu.memory_space<vmem>>, %arg6: memref<4x1xf32, #tpu.memory_space<vmem>>, %arg7: memref<4x1xf32, #tpu.memory_space<vmem>>, %arg8: memref<4x1xf32, #tpu.memory_space<vmem>>, %arg9: memref<1x36xf32, #tpu.memory_space<vmem>>, %arg10: memref<1x1xf32, #tpu.memory_space<vmem>>, %arg11: memref<2x9xf32, #tpu.memory_space<vmem>>, %arg12: memref<1xf32, #tpu.memory_space<smem>>, %arg13: memref<1xf32, #tpu.memory_space<smem>>, %arg14: memref<1x512xf32, #tpu.memory_space<vmem>>) attributes {dimension_semantics = [], scalar_prefetch = 0 : i64, scratch_operands = 0 : i64, tpu.core_type = #tpu.core_type<tc>} {
    %c0 = arith.constant 0 : index
    %c0_0 = arith.constant 0 : index
    %0 = vector.load %arg0[%c0, %c0_0] : memref<1x512xf32, #tpu.memory_space<vmem>>, vector<1x512xf32>
    %c0_1 = arith.constant 0 : index
    %c0_2 = arith.constant 0 : index
    %1 = vector.load %arg1[%c0_1, %c0_2] : memref<9x512xf32, #tpu.memory_space<vmem>>, vector<9x512xf32>
    %c0_3 = arith.constant 0 : index
    %c0_4 = arith.constant 0 : index
    %2 = vector.load %arg2[%c0_3, %c0_4] : memref<36x512xf32, #tpu.memory_space<vmem>>, vector<36x512xf32>
    %c0_5 = arith.constant 0 : index
    %c0_6 = arith.constant 0 : index
    %3 = vector.load %arg3[%c0_5, %c0_6] : memref<4x9xf32, #tpu.memory_space<vmem>>, vector<4x9xf32>
    %c0_7 = arith.constant 0 : index
    %c0_8 = arith.constant 0 : index
    %4 = vector.load %arg4[%c0_7, %c0_8] : memref<4x1xf32, #tpu.memory_space<vmem>>, vector<4x1xf32>
    %c0_9 = arith.constant 0 : index
    %c0_10 = arith.constant 0 : index
    %5 = vector.load %arg5[%c0_9, %c0_10] : memref<4x36xf32, #tpu.memory_space<vmem>>, vector<4x36xf32>
    %c0_11 = arith.constant 0 : index
    %c0_12 = arith.constant 0 : index
    %6 = vector.load %arg6[%c0_11, %c0_12] : memref<4x1xf32, #tpu.memory_space<vmem>>, vector<4x1xf32>
    %c0_13 = arith.constant 0 : index
    %c0_14 = arith.constant 0 : index
    %7 = vector.load %arg7[%c0_13, %c0_14] : memref<4x1xf32, #tpu.memory_space<vmem>>, vector<4x1xf32>
    %c0_15 = arith.constant 0 : index
    %c0_16 = arith.constant 0 : index
    %8 = vector.load %arg8[%c0_15, %c0_16] : memref<4x1xf32, #tpu.memory_space<vmem>>, vector<4x1xf32>
    %c0_17 = arith.constant 0 : index
    %c0_18 = arith.constant 0 : index
    %9 = vector.load %arg9[%c0_17, %c0_18] : memref<1x36xf32, #tpu.memory_space<vmem>>, vector<1x36xf32>
    %c0_19 = arith.constant 0 : index
    %c0_20 = arith.constant 0 : index
    %10 = vector.load %arg10[%c0_19, %c0_20] : memref<1x1xf32, #tpu.memory_space<vmem>>, vector<1x1xf32>
    %c0_21 = arith.constant 0 : index
    %c0_22 = arith.constant 0 : index
    %11 = vector.load %arg11[%c0_21, %c0_22] : memref<2x9xf32, #tpu.memory_space<vmem>>, vector<2x9xf32>
    %c0_23 = arith.constant 0 : index
    %12 = memref.load %arg12[%c0_23] : memref<1xf32, #tpu.memory_space<smem>>
    %c0_24 = arith.constant 0 : index
    %13 = memref.load %arg13[%c0_24] : memref<1xf32, #tpu.memory_space<smem>>
    %c17_i32 = arith.constant 17 : i32
    %14 = tpu.dynamic_rotate %0 by %c17_i32 dim 1 : vector<1x512xf32>, i32 -> vector<1x512xf32>
    %c16_i32 = arith.constant 16 : i32
    %15 = tpu.dynamic_rotate %0 by %c16_i32 dim 1 : vector<1x512xf32>, i32 -> vector<1x512xf32>
    %c15_i32 = arith.constant 15 : i32
    %16 = tpu.dynamic_rotate %0 by %c15_i32 dim 1 : vector<1x512xf32>, i32 -> vector<1x512xf32>
    %c1_i32 = arith.constant 1 : i32
    %17 = tpu.dynamic_rotate %0 by %c1_i32 dim 1 : vector<1x512xf32>, i32 -> vector<1x512xf32>
    %c511_i32 = arith.constant 511 : i32
    %18 = tpu.dynamic_rotate %0 by %c511_i32 dim 1 : vector<1x512xf32>, i32 -> vector<1x512xf32>
    %c497_i32 = arith.constant 497 : i32
    %19 = tpu.dynamic_rotate %0 by %c497_i32 dim 1 : vector<1x512xf32>, i32 -> vector<1x512xf32>
    %c496_i32 = arith.constant 496 : i32
    %20 = tpu.dynamic_rotate %0 by %c496_i32 dim 1 : vector<1x512xf32>, i32 -> vector<1x512xf32>
    %c495_i32 = arith.constant 495 : i32
    %21 = tpu.dynamic_rotate %0 by %c495_i32 dim 1 : vector<1x512xf32>, i32 -> vector<1x512xf32>
    %22 = tpu.concatenate %14, %15, %16, %17, %0, %18, %19, %20, %21 in 0 : vector<1x512xf32>, vector<1x512xf32>, vector<1x512xf32>, vector<1x512xf32>, vector<1x512xf32>, vector<1x512xf32>, vector<1x512xf32>, vector<1x512xf32>, vector<1x512xf32> -> vector<9x512xf32>
    %23 = arith.mulf %22, %1 : vector<9x512xf32>
    %cst = arith.constant dense<0.000000e+00> : vector<2x512xf32>
    %24 = tpu.matmul %11, %23, %cst {dimension_numbers = #tpu.dot_dimension_numbers<[1], [0], [0], [1], [0, 0, 1, 1], [], []>} : vector<2x9xf32>, vector<9x512xf32>, vector<2x512xf32> -> vector<2x512xf32>
    %25 = math.absf %24 : vector<2x512xf32>
    %26 = vector.extract_strided_slice %25 {offsets = [0, 0], sizes = [1, 512], strides = [1, 1]} : vector<2x512xf32> to vector<1x512xf32>
    %27 = vector.extract_strided_slice %25 {offsets = [1, 0], sizes = [1, 512], strides = [1, 1]} : vector<2x512xf32> to vector<1x512xf32>
    %28 = arith.addf %26, %27 : vector<1x512xf32>
    %29 = vector.broadcast %12 : f32 to vector<1x512xf32>
    %30 = arith.mulf %29, %28 : vector<1x512xf32>
    %31 = vector.broadcast %13 : f32 to vector<1x512xf32>
    %32 = arith.addf %30, %31 : vector<1x512xf32>
    %cst_25 = arith.constant dense<0.000000e+00> : vector<4x512xf32>
    %33 = tpu.matmul %3, %23, %cst_25 {dimension_numbers = #tpu.dot_dimension_numbers<[1], [0], [0], [1], [0, 0, 1, 1], [], []>} : vector<4x9xf32>, vector<9x512xf32>, vector<4x512xf32> -> vector<4x512xf32>
    %34 = vector.broadcast %4 : vector<4x1xf32> to vector<4x512xf32>
    %35 = arith.addf %33, %34 : vector<4x512xf32>
    %cst_26 = arith.constant 0.000000e+00 : f32
    %36 = vector.broadcast %cst_26 : f32 to vector<4x512xf32>
    %37 = arith.maximumf %35, %36 : vector<4x512xf32>
    %c17_i32_27 = arith.constant 17 : i32
    %38 = tpu.dynamic_rotate %37 by %c17_i32_27 dim 1 : vector<4x512xf32>, i32 -> vector<4x512xf32>
    %c16_i32_28 = arith.constant 16 : i32
    %39 = tpu.dynamic_rotate %37 by %c16_i32_28 dim 1 : vector<4x512xf32>, i32 -> vector<4x512xf32>
    %c15_i32_29 = arith.constant 15 : i32
    %40 = tpu.dynamic_rotate %37 by %c15_i32_29 dim 1 : vector<4x512xf32>, i32 -> vector<4x512xf32>
    %c1_i32_30 = arith.constant 1 : i32
    %41 = tpu.dynamic_rotate %37 by %c1_i32_30 dim 1 : vector<4x512xf32>, i32 -> vector<4x512xf32>
    %c511_i32_31 = arith.constant 511 : i32
    %42 = tpu.dynamic_rotate %37 by %c511_i32_31 dim 1 : vector<4x512xf32>, i32 -> vector<4x512xf32>
    %c497_i32_32 = arith.constant 497 : i32
    %43 = tpu.dynamic_rotate %37 by %c497_i32_32 dim 1 : vector<4x512xf32>, i32 -> vector<4x512xf32>
    %c496_i32_33 = arith.constant 496 : i32
    %44 = tpu.dynamic_rotate %37 by %c496_i32_33 dim 1 : vector<4x512xf32>, i32 -> vector<4x512xf32>
    %c495_i32_34 = arith.constant 495 : i32
    %45 = tpu.dynamic_rotate %37 by %c495_i32_34 dim 1 : vector<4x512xf32>, i32 -> vector<4x512xf32>
    %46 = tpu.concatenate %38, %39, %40, %41, %37, %42, %43, %44, %45 in 0 : vector<4x512xf32>, vector<4x512xf32>, vector<4x512xf32>, vector<4x512xf32>, vector<4x512xf32>, vector<4x512xf32>, vector<4x512xf32>, vector<4x512xf32>, vector<4x512xf32> -> vector<36x512xf32>
    %47 = arith.mulf %46, %2 : vector<36x512xf32>
    %cst_35 = arith.constant dense<0.000000e+00> : vector<4x512xf32>
    %48 = tpu.matmul %5, %47, %cst_35 {dimension_numbers = #tpu.dot_dimension_numbers<[1], [0], [0], [1], [0, 0, 1, 1], [], []>} : vector<4x36xf32>, vector<36x512xf32>, vector<4x512xf32> -> vector<4x512xf32>
    %49 = vector.broadcast %6 : vector<4x1xf32> to vector<4x512xf32>
    %50 = arith.addf %48, %49 : vector<4x512xf32>
    %cst_36 = arith.constant dense<0.000000e+00> : vector<4xf32>
    %51 = vector.multi_reduction <add>, %50, %cst_36 [1] : vector<4x512xf32> to vector<4xf32>
    %52 = vector.shape_cast %51 : vector<4xf32> to vector<4x1xf32>
    %cst_37 = arith.constant 5.120000e+02 : f32
    %53 = vector.broadcast %cst_37 : f32 to vector<4x1xf32>
    %54 = arith.divf %52, %53 : vector<4x1xf32>
    %55 = arith.mulf %50, %50 : vector<4x512xf32>
    %cst_38 = arith.constant dense<0.000000e+00> : vector<4xf32>
    %56 = vector.multi_reduction <add>, %55, %cst_38 [1] : vector<4x512xf32> to vector<4xf32>
    %57 = vector.shape_cast %56 : vector<4xf32> to vector<4x1xf32>
    %cst_39 = arith.constant 5.120000e+02 : f32
    %58 = vector.broadcast %cst_39 : f32 to vector<4x1xf32>
    %59 = arith.divf %57, %58 : vector<4x1xf32>
    %60 = arith.mulf %54, %54 : vector<4x1xf32>
    %61 = arith.subf %59, %60 : vector<4x1xf32>
    %cst_40 = arith.constant 0.000000e+00 : f32
    %62 = vector.broadcast %cst_40 : f32 to vector<4x1xf32>
    %63 = arith.maximumf %61, %62 : vector<4x1xf32>
    %64 = vector.broadcast %54 : vector<4x1xf32> to vector<4x512xf32>
    %65 = arith.subf %50, %64 : vector<4x512xf32>
    %cst_41 = arith.constant 9.99999974E-6 : f32
    %66 = vector.broadcast %cst_41 : f32 to vector<4x1xf32>
    %67 = arith.addf %63, %66 : vector<4x1xf32>
    %68 = math.rsqrt %67 : vector<4x1xf32>
    %69 = vector.broadcast %68 : vector<4x1xf32> to vector<4x512xf32>
    %70 = arith.mulf %65, %69 : vector<4x512xf32>
    %71 = vector.broadcast %7 : vector<4x1xf32> to vector<4x512xf32>
    %72 = arith.mulf %71, %70 : vector<4x512xf32>
    %73 = vector.broadcast %8 : vector<4x1xf32> to vector<4x512xf32>
    %74 = arith.addf %72, %73 : vector<4x512xf32>
    %cst_42 = arith.constant 0.000000e+00 : f32
    %75 = vector.broadcast %cst_42 : f32 to vector<4x512xf32>
    %76 = arith.maximumf %74, %75 : vector<4x512xf32>
    %77 = arith.addf %37, %76 : vector<4x512xf32>
    %c17_i32_43 = arith.constant 17 : i32
    %78 = tpu.dynamic_rotate %77 by %c17_i32_43 dim 1 : vector<4x512xf32>, i32 -> vector<4x512xf32>
    %c16_i32_44 = arith.constant 16 : i32
    %79 = tpu.dynamic_rotate %77 by %c16_i32_44 dim 1 : vector<4x512xf32>, i32 -> vector<4x512xf32>
    %c15_i32_45 = arith.constant 15 : i32
    %80 = tpu.dynamic_rotate %77 by %c15_i32_45 dim 1 : vector<4x512xf32>, i32 -> vector<4x512xf32>
    %c1_i32_46 = arith.constant 1 : i32
    %81 = tpu.dynamic_rotate %77 by %c1_i32_46 dim 1 : vector<4x512xf32>, i32 -> vector<4x512xf32>
    %c511_i32_47 = arith.constant 511 : i32
    %82 = tpu.dynamic_rotate %77 by %c511_i32_47 dim 1 : vector<4x512xf32>, i32 -> vector<4x512xf32>
    %c497_i32_48 = arith.constant 497 : i32
    %83 = tpu.dynamic_rotate %77 by %c497_i32_48 dim 1 : vector<4x512xf32>, i32 -> vector<4x512xf32>
    %c496_i32_49 = arith.constant 496 : i32
    %84 = tpu.dynamic_rotate %77 by %c496_i32_49 dim 1 : vector<4x512xf32>, i32 -> vector<4x512xf32>
    %c495_i32_50 = arith.constant 495 : i32
    %85 = tpu.dynamic_rotate %77 by %c495_i32_50 dim 1 : vector<4x512xf32>, i32 -> vector<4x512xf32>
    %86 = tpu.concatenate %78, %79, %80, %81, %77, %82, %83, %84, %85 in 0 : vector<4x512xf32>, vector<4x512xf32>, vector<4x512xf32>, vector<4x512xf32>, vector<4x512xf32>, vector<4x512xf32>, vector<4x512xf32>, vector<4x512xf32>, vector<4x512xf32> -> vector<36x512xf32>
    %87 = arith.mulf %86, %2 : vector<36x512xf32>
    %cst_51 = arith.constant dense<0.000000e+00> : vector<4x512xf32>
    %88 = tpu.matmul %5, %87, %cst_51 {dimension_numbers = #tpu.dot_dimension_numbers<[1], [0], [0], [1], [0, 0, 1, 1], [], []>} : vector<4x36xf32>, vector<36x512xf32>, vector<4x512xf32> -> vector<4x512xf32>
    %89 = vector.broadcast %6 : vector<4x1xf32> to vector<4x512xf32>
    %90 = arith.addf %88, %89 : vector<4x512xf32>
    %cst_52 = arith.constant dense<0.000000e+00> : vector<4xf32>
    %91 = vector.multi_reduction <add>, %90, %cst_52 [1] : vector<4x512xf32> to vector<4xf32>
    %92 = vector.shape_cast %91 : vector<4xf32> to vector<4x1xf32>
    %cst_53 = arith.constant 5.120000e+02 : f32
    %93 = vector.broadcast %cst_53 : f32 to vector<4x1xf32>
    %94 = arith.divf %92, %93 : vector<4x1xf32>
    %95 = arith.mulf %90, %90 : vector<4x512xf32>
    %cst_54 = arith.constant dense<0.000000e+00> : vector<4xf32>
    %96 = vector.multi_reduction <add>, %95, %cst_54 [1] : vector<4x512xf32> to vector<4xf32>
    %97 = vector.shape_cast %96 : vector<4xf32> to vector<4x1xf32>
    %cst_55 = arith.constant 5.120000e+02 : f32
    %98 = vector.broadcast %cst_55 : f32 to vector<4x1xf32>
    %99 = arith.divf %97, %98 : vector<4x1xf32>
    %100 = arith.mulf %94, %94 : vector<4x1xf32>
    %101 = arith.subf %99, %100 : vector<4x1xf32>
    %cst_56 = arith.constant 0.000000e+00 : f32
    %102 = vector.broadcast %cst_56 : f32 to vector<4x1xf32>
    %103 = arith.maximumf %101, %102 : vector<4x1xf32>
    %104 = vector.broadcast %94 : vector<4x1xf32> to vector<4x512xf32>
    %105 = arith.subf %90, %104 : vector<4x512xf32>
    %cst_57 = arith.constant 9.99999974E-6 : f32
    %106 = vector.broadcast %cst_57 : f32 to vector<4x1xf32>
    %107 = arith.addf %103, %106 : vector<4x1xf32>
    %108 = math.rsqrt %107 : vector<4x1xf32>
    %109 = vector.broadcast %108 : vector<4x1xf32> to vector<4x512xf32>
    %110 = arith.mulf %105, %109 : vector<4x512xf32>
    %111 = vector.broadcast %7 : vector<4x1xf32> to vector<4x512xf32>
    %112 = arith.mulf %111, %110 : vector<4x512xf32>
    %113 = vector.broadcast %8 : vector<4x1xf32> to vector<4x512xf32>
    %114 = arith.addf %112, %113 : vector<4x512xf32>
    %cst_58 = arith.constant 0.000000e+00 : f32
    %115 = vector.broadcast %cst_58 : f32 to vector<4x512xf32>
    %116 = arith.maximumf %114, %115 : vector<4x512xf32>
    %117 = arith.addf %77, %116 : vector<4x512xf32>
    %c17_i32_59 = arith.constant 17 : i32
    %118 = tpu.dynamic_rotate %117 by %c17_i32_59 dim 1 : vector<4x512xf32>, i32 -> vector<4x512xf32>
    %c16_i32_60 = arith.constant 16 : i32
    %119 = tpu.dynamic_rotate %117 by %c16_i32_60 dim 1 : vector<4x512xf32>, i32 -> vector<4x512xf32>
    %c15_i32_61 = arith.constant 15 : i32
    %120 = tpu.dynamic_rotate %117 by %c15_i32_61 dim 1 : vector<4x512xf32>, i32 -> vector<4x512xf32>
    %c1_i32_62 = arith.constant 1 : i32
    %121 = tpu.dynamic_rotate %117 by %c1_i32_62 dim 1 : vector<4x512xf32>, i32 -> vector<4x512xf32>
    %c511_i32_63 = arith.constant 511 : i32
    %122 = tpu.dynamic_rotate %117 by %c511_i32_63 dim 1 : vector<4x512xf32>, i32 -> vector<4x512xf32>
    %c497_i32_64 = arith.constant 497 : i32
    %123 = tpu.dynamic_rotate %117 by %c497_i32_64 dim 1 : vector<4x512xf32>, i32 -> vector<4x512xf32>
    %c496_i32_65 = arith.constant 496 : i32
    %124 = tpu.dynamic_rotate %117 by %c496_i32_65 dim 1 : vector<4x512xf32>, i32 -> vector<4x512xf32>
    %c495_i32_66 = arith.constant 495 : i32
    %125 = tpu.dynamic_rotate %117 by %c495_i32_66 dim 1 : vector<4x512xf32>, i32 -> vector<4x512xf32>
    %126 = tpu.concatenate %118, %119, %120, %121, %117, %122, %123, %124, %125 in 0 : vector<4x512xf32>, vector<4x512xf32>, vector<4x512xf32>, vector<4x512xf32>, vector<4x512xf32>, vector<4x512xf32>, vector<4x512xf32>, vector<4x512xf32>, vector<4x512xf32> -> vector<36x512xf32>
    %127 = arith.mulf %126, %2 : vector<36x512xf32>
    %cst_67 = arith.constant dense<0.000000e+00> : vector<4x512xf32>
    %128 = tpu.matmul %5, %127, %cst_67 {dimension_numbers = #tpu.dot_dimension_numbers<[1], [0], [0], [1], [0, 0, 1, 1], [], []>} : vector<4x36xf32>, vector<36x512xf32>, vector<4x512xf32> -> vector<4x512xf32>
    %129 = vector.broadcast %6 : vector<4x1xf32> to vector<4x512xf32>
    %130 = arith.addf %128, %129 : vector<4x512xf32>
    %cst_68 = arith.constant dense<0.000000e+00> : vector<4xf32>
    %131 = vector.multi_reduction <add>, %130, %cst_68 [1] : vector<4x512xf32> to vector<4xf32>
    %132 = vector.shape_cast %131 : vector<4xf32> to vector<4x1xf32>
    %cst_69 = arith.constant 5.120000e+02 : f32
    %133 = vector.broadcast %cst_69 : f32 to vector<4x1xf32>
    %134 = arith.divf %132, %133 : vector<4x1xf32>
    %135 = arith.mulf %130, %130 : vector<4x512xf32>
    %cst_70 = arith.constant dense<0.000000e+00> : vector<4xf32>
    %136 = vector.multi_reduction <add>, %135, %cst_70 [1] : vector<4x512xf32> to vector<4xf32>
    %137 = vector.shape_cast %136 : vector<4xf32> to vector<4x1xf32>
    %cst_71 = arith.constant 5.120000e+02 : f32
    %138 = vector.broadcast %cst_71 : f32 to vector<4x1xf32>
    %139 = arith.divf %137, %138 : vector<4x1xf32>
    %140 = arith.mulf %134, %134 : vector<4x1xf32>
    %141 = arith.subf %139, %140 : vector<4x1xf32>
    %cst_72 = arith.constant 0.000000e+00 : f32
    %142 = vector.broadcast %cst_72 : f32 to vector<4x1xf32>
    %143 = arith.maximumf %141, %142 : vector<4x1xf32>
    %144 = vector.broadcast %134 : vector<4x1xf32> to vector<4x512xf32>
    %145 = arith.subf %130, %144 : vector<4x512xf32>
    %cst_73 = arith.constant 9.99999974E-6 : f32
    %146 = vector.broadcast %cst_73 : f32 to vector<4x1xf32>
    %147 = arith.addf %143, %146 : vector<4x1xf32>
    %148 = math.rsqrt %147 : vector<4x1xf32>
    %149 = vector.broadcast %148 : vector<4x1xf32> to vector<4x512xf32>
    %150 = arith.mulf %145, %149 : vector<4x512xf32>
    %151 = vector.broadcast %7 : vector<4x1xf32> to vector<4x512xf32>
    %152 = arith.mulf %151, %150 : vector<4x512xf32>
    %153 = vector.broadcast %8 : vector<4x1xf32> to vector<4x512xf32>
    %154 = arith.addf %152, %153 : vector<4x512xf32>
    %cst_74 = arith.constant 0.000000e+00 : f32
    %155 = vector.broadcast %cst_74 : f32 to vector<4x512xf32>
    %156 = arith.maximumf %154, %155 : vector<4x512xf32>
    %157 = arith.addf %117, %156 : vector<4x512xf32>
    %c17_i32_75 = arith.constant 17 : i32
    %158 = tpu.dynamic_rotate %157 by %c17_i32_75 dim 1 : vector<4x512xf32>, i32 -> vector<4x512xf32>
    %c16_i32_76 = arith.constant 16 : i32
    %159 = tpu.dynamic_rotate %157 by %c16_i32_76 dim 1 : vector<4x512xf32>, i32 -> vector<4x512xf32>
    %c15_i32_77 = arith.constant 15 : i32
    %160 = tpu.dynamic_rotate %157 by %c15_i32_77 dim 1 : vector<4x512xf32>, i32 -> vector<4x512xf32>
    %c1_i32_78 = arith.constant 1 : i32
    %161 = tpu.dynamic_rotate %157 by %c1_i32_78 dim 1 : vector<4x512xf32>, i32 -> vector<4x512xf32>
    %c511_i32_79 = arith.constant 511 : i32
    %162 = tpu.dynamic_rotate %157 by %c511_i32_79 dim 1 : vector<4x512xf32>, i32 -> vector<4x512xf32>
    %c497_i32_80 = arith.constant 497 : i32
    %163 = tpu.dynamic_rotate %157 by %c497_i32_80 dim 1 : vector<4x512xf32>, i32 -> vector<4x512xf32>
    %c496_i32_81 = arith.constant 496 : i32
    %164 = tpu.dynamic_rotate %157 by %c496_i32_81 dim 1 : vector<4x512xf32>, i32 -> vector<4x512xf32>
    %c495_i32_82 = arith.constant 495 : i32
    %165 = tpu.dynamic_rotate %157 by %c495_i32_82 dim 1 : vector<4x512xf32>, i32 -> vector<4x512xf32>
    %166 = tpu.concatenate %158, %159, %160, %161, %157, %162, %163, %164, %165 in 0 : vector<4x512xf32>, vector<4x512xf32>, vector<4x512xf32>, vector<4x512xf32>, vector<4x512xf32>, vector<4x512xf32>, vector<4x512xf32>, vector<4x512xf32>, vector<4x512xf32> -> vector<36x512xf32>
    %167 = arith.mulf %166, %2 : vector<36x512xf32>
    %cst_83 = arith.constant dense<0.000000e+00> : vector<1x512xf32>
    %168 = tpu.matmul %9, %167, %cst_83 {dimension_numbers = #tpu.dot_dimension_numbers<[1], [0], [0], [1], [0, 0, 1, 1], [], []>} : vector<1x36xf32>, vector<36x512xf32>, vector<1x512xf32> -> vector<1x512xf32>
    %169 = vector.broadcast %10 : vector<1x1xf32> to vector<1x512xf32>
    %170 = arith.addf %168, %169 : vector<1x512xf32>
    %171 = arith.negf %170 : vector<1x512xf32>
    %172 = math.exp %171 : vector<1x512xf32>
    %cst_84 = arith.constant 1.000000e+00 : f32
    %173 = vector.broadcast %cst_84 : f32 to vector<1x512xf32>
    %174 = arith.addf %173, %172 : vector<1x512xf32>
    %175 = arith.divf %173, %174 : vector<1x512xf32>
    %176 = arith.addf %175, %0 : vector<1x512xf32>
    %177 = arith.addf %32, %176 : vector<1x512xf32>
    %cst_85 = arith.constant 9.99999974E-5 : f32
    %cst_86 = arith.constant 1.000000e+00 : f32
    %178 = vector.broadcast %cst_85 : f32 to vector<1x512xf32>
    %179 = arith.maximumf %178, %177 : vector<1x512xf32>
    %180 = vector.broadcast %cst_86 : f32 to vector<1x512xf32>
    %181 = arith.minimumf %180, %179 : vector<1x512xf32>
    %c0_87 = arith.constant 0 : index
    %c0_88 = arith.constant 0 : index
    %182 = vector.load %arg14[%c0_87, %c0_88] : memref<1x512xf32, #tpu.memory_space<vmem>>, vector<1x512xf32>
    tpu.vector_store %arg14[%c0_87, %c0_88], %181 {strides = array<i32>} : memref<1x512xf32, #tpu.memory_space<vmem>>, vector<1x512xf32>,
    return
  }
}

</mosaic_0001>

<bundles_post_ra>
// kernel: tpu_custom_call.1
= control target key start
LH: loop header
LB: loop body
LE: loop exit
PB: predicated region body
PF: predicated region fallthrough
CT: control target
= control target key end

     0   :  { %s3863_s0 = inlined_call_operand.vmem [shape: f32[1,512], index: 0, kind: input, shape index: {}]   ;;  %s3864_s1 = inlined_call_operand.hbm [shape: f32[9,512], index: 1, kind: input, shape index: {}]   ;;  %s3865_s2 = inlined_call_operand.hbm [shape: f32[36,512], index: 2, kind: input, shape index: {}]   ;;  %s3866_s3 = inlined_call_operand.vmem [shape: f32[4,9], index: 3, kind: input, shape index: {}]   ;;  %s3867_s4 = inlined_call_operand.vmem [shape: f32[4,1], index: 4, kind: input, shape index: {}]   ;;  %s3868_s5 = inlined_call_operand.vmem [shape: f32[4,36], index: 5, kind: input, shape index: {}]   ;;  %s3869_s6 = inlined_call_operand.vmem [shape: f32[4,1], index: 6, kind: input, shape index: {}]   ;;  %s3870_s7 = inlined_call_operand.vmem [shape: f32[4,1], index: 7, kind: input, shape index: {}]   ;;  %s3871_s8 = inlined_call_operand.vmem [shape: f32[4,1], index: 8, kind: input, shape index: {}]   ;;  %s3872_s9 = inlined_call_operand.vmem [shape: f32[1,36], index: 9, kind: input, shape index: {}]   ;;  %s3873_s10 = inlined_call_operand.<no memory space> [shape: f32[1,1], index: 10, kind: input, shape index: {}]   ;;  %s3874_s11 = inlined_call_operand.vmem [shape: f32[2,9], index: 11, kind: input, shape index: {}]   ;;  %s3875_s12 = inlined_call_operand.<no memory space> [shape: f32[1], index: 12, kind: input, shape index: {}]   ;;  %s3876_s13 = inlined_call_operand.<no memory space> [shape: f32[1], index: 13, kind: input, shape index: {}]   ;;  %s3877_s14 = inlined_call_operand.hbm [shape: f32[1,512], index: 14, kind: output, shape index: {}]  }
   0x1   :  { %v19_v0 = vstv %s3873_s10 }
   0x2   :  { %20 = vst [vmem:[#allocation2] sm:$0x1] %v19_v0 }
   0x3   :  { %23 = vsyncpa [#allocation6], 0 }
   0x4   :  { %24 = vsyncpa [#allocation9], 0 }
   0x5   :  { %25 = vsyncpa [#allocation7], 0  ;;  %s2582_s15 = smov [#allocation5]   ;;  %s2510_s19 = scalar_lea.hbm %s3864_s1, 1024 }
   0x6   :  { %s33_s16 = sshll.u32 %s2582_s15, 4  ;;  %p2511_p0 = scmp.ne.s32.totalorder %s3864_s1, %s2510_s19  ;;  %s34_s16 = int_to_ptr.vmem [resolvable:$true] %s33_s16 }
   0x7   :  { %p2514_p1 = scmp.lt.u32.totalorder %s2510_s19, %s3864_s1 }
   0x9   :  { %p2516_p2 = pnand %p2514_p1, %p2511_p0 }
   0xb   :  { %2519 = shalt.err (!%p2516_p2)
}
   0xc   :  { %s2520_s10 = scalar_lea.vmem %s34_s16, 1024  ;;  %p2525_p4 = scmp.lt.s32.totalorder %s34_s16, %s34_s16 }
   0xd   :  { %p2521_p3 = scmp.ne.s32.totalorder %s34_s16, %s2520_s10  ;;  %p2526_p5 = scmp.lt.s32.totalorder %s2520_s10, %s2520_s10 }
   0xf   :  { %p2527_p6 = por %p2526_p5, %p2525_p4 }
  0x11   :  { %p2528_p7 = pnand %p2527_p6, %p2521_p3 }
  0x13   :  { %2531 = shalt.err (!%p2528_p7)
}
  0x14   :  { %s2583_s24 = smov 512   ;;  %s2584_s25 = smov 32  }
  0x15   :  { %39 = dma.hbm_to_vmem [thread:$0]  %s3864_s1, 1024, %s34_s16, [#allocation6], %s2583_s24, %s2583_s24, %s2584_s25  }
  0x16   :  { %s2585_s28 = smov [#allocation8]   ;;  %s2532_s17 = scalar_lea.hbm %s3865_s2, 2560 }
  0x17   :  { %s45_s29 = sshll.u32 %s2585_s28, 4  ;;  %p2533_p8 = scmp.ne.s32.totalorder %s3865_s2, %s2532_s17  ;;  %s46_s29 = int_to_ptr.vmem [resolvable:$true] %s45_s29 }
  0x18   :  { %p2536_p9 = scmp.lt.u32.totalorder %s2532_s17, %s3865_s2 }
  0x1a   :  { %p2538_p10 = pnand %p2536_p9, %p2533_p8 }
  0x1c   :  { %2541 = shalt.err (!%p2538_p10)
}
  0x1d   :  { %s2542_s22 = scalar_lea.vmem %s46_s29, 2560  ;;  %p2547_p12 = scmp.lt.s32.totalorder %s46_s29, %s46_s29 }
  0x1e   :  { %p2543_p11 = scmp.ne.s32.totalorder %s46_s29, %s2542_s22  ;;  %p2548_p13 = scmp.lt.s32.totalorder %s2542_s22, %s2542_s22 }
  0x20   :  { %p2549_p0 = por %p2548_p13, %p2547_p12 }
  0x22   :  { %p2550_p1 = pnand %p2549_p0, %p2543_p11 }
  0x24   :  { %2553 = shalt.err (!%p2550_p1)
}
  0x25   :  { %51 = dma.hbm_to_vmem [thread:$0]  %s3865_s2, 2560, %s46_s29, [#allocation9], %s2583_s24, %s2583_s24, %s2584_s25  }
  0x26   :  { %2576 = dma.done.wait [#allocation6], 1024  }
  0x27   :  { %2577 = vsyncadd [#allocation6], 4294966272 }
  0x28   :  { %2578 = dma.done.wait [#allocation9], 2560  }
  0x29   :  { %2579 = vsyncadd [#allocation9], 4294964736  ;;  %v3878_v1 = vlaneseq  ;;  %v80_v7 = vld [vmem:[%s3863_s0] sm:$0xf]  ;;  %s2586_s2 = smov 16   ;;  %s2587_s0 = smov 15  }
  0x2a   :  { %s2588_s24 = smov 17   ;;  %s2589_s25 = smov 1   ;;  %v3880_v12 = vmov 0.0   ;;  %v2595_v13 = vmov 0   ;;  %v110_v14 = vld [vmem:[%s3867_s4] sm:$0xf] }
  0x2b   :  { %v2702_v2 = vshrl.u32 %v3878_v1, 7  ;;  %s2590_s26 = smov 127   ;;  %s2591_s27 = smov 113   ;;  %442 = vmatprep.mubr.f32.mxu0 %v3880_v12  ;;  %513 = vmatprep.mubr.f32.mxu1 %v3880_v12  ;;  %v2791_v29 = vand.u32 127, %v3878_v1  ;;  %vm319_vm4 = vcmask 1040384   ;;  %vm324_vm5 = vcmask 1041408  }
  0x2c   :  { %s2592_s28 = smov 112   ;;  %s2594_s29 = smov 111   ;;  %2466 = vset.pattern.permute.xlu0 %v2595_v13  ;;  %2467 = vset.pattern.permute.xlu1 %v2595_v13  ;;  %vm329_vm6 = vcmask 1042432   ;;  %vm334_vm7 = vcmask 1043456   ;;  %vm339_vm11 = vcmask 1044480   ;;  %vm344_vm12 = vcmask 1045504  }
  0x2d   :  { %v131_v3 = vsub.s32 2, %v2702_v2  ;;  %v3879_v4 = vsub.s32 0, %v2702_v2  ;;  %v135_v5 = vsub.s32 3, %v2702_v2  ;;  %v127_v6 = vsub.s32 1, %v2702_v2 }
  0x2e   :  { %vm164_vm0 = vcmp.lt.s32.totalorder %v2791_v29, 16  ;;  %vm151_vm1 = vcmp.lt.s32.totalorder %v2791_v29, 17  ;;  %vm190_vm2 = vcmp.lt.s32.totalorder %v2791_v29, 1  ;;  %vm177_vm3 = vcmp.lt.s32.totalorder %v2791_v29, 15 }
  0x2f   :  { %v2711_v8 = vrot.slane %v80_v7, %v131_v3  ;;  %v2715_v9 = vrot.slane %v80_v7, %v3879_v4  ;;  %v2721_v10 = vrot.slane %v80_v7, %v135_v5  ;;  %v2723_v11 = vrot.slane %v80_v7, %v127_v6 }
  0x30   :  { %vm203_vm8 = vcmp.lt.s32.totalorder %v2791_v29, 127  ;;  %vm216_vm9 = vcmp.lt.s32.totalorder %v2791_v29, 113  ;;  %vm229_vm10 = vcmp.lt.s32.totalorder %v2791_v29, 112  ;;  %vm349_vm13 = vcmask 1046528  }
  0x31   :  { %160 = vrot.lane.b32.xlu1 %v2711_v8, %s2586_s2  ;;  %156 = vrot.lane.b32.xlu0 %v2715_v9, %s2586_s2  ;;  %3883 = vst [vmem:[#allocation14_spill] sm:$0xff] %v2721_v10  ;;  %vm242_vm14 = vcmp.lt.s32.totalorder %v2791_v29, 111  ;;  %vm2596_vm15 = vmmov 1  }
  0x35   :  { %162 = vrot.lane.b32.xlu1 %v2721_v10, %s2586_s2  ;;  %158 = vrot.lane.b32.xlu0 %v2723_v11, %s2586_s2 }
  0x39   :  { %171 = vrot.lane.b32.xlu1 %v2723_v11, %s2587_s0  ;;  %169 = vrot.lane.b32.xlu0 %v2715_v9, %s2587_s0 }
  0x3d   :  { %143 = vrot.lane.b32.xlu1 %v2723_v11, %s2588_s24  ;;  %141 = vrot.lane.b32.xlu0 %v2715_v9, %s2588_s24 }
  0x41   :  { %175 = vrot.lane.b32.xlu1 %v2721_v10, %s2587_s0  ;;  %173 = vrot.lane.b32.xlu0 %v2711_v8, %s2587_s0 }
  0x45   :  { %184 = vrot.lane.b32.xlu1 %v2723_v11, %s2589_s25  ;;  %182 = vrot.lane.b32.xlu0 %v2715_v9, %s2589_s25 }
  0x49   :  { %147 = vrot.lane.b32.xlu1 %v2721_v10, %s2588_s24  ;;  %145 = vrot.lane.b32.xlu0 %v2711_v8, %s2588_s24 }
  0x4d   :  { %188 = vrot.lane.b32.xlu1 %v2721_v10, %s2589_s25  ;;  %186 = vrot.lane.b32.xlu0 %v2711_v8, %s2589_s25 }
  0x51   :  { %199 = vrot.lane.b32.xlu1 %v2711_v8, %s2590_s26  ;;  %197 = vrot.lane.b32.xlu0 %v2723_v11, %s2590_s26 }
  0x55   :  { %201 = vrot.lane.b32.xlu1 %v2721_v10, %s2590_s26  ;;  %195 = vrot.lane.b32.xlu0 %v2715_v9, %s2590_s26 }
  0x59   :  { %212 = vrot.lane.b32.xlu1 %v2711_v8, %s2591_s27  ;;  %210 = vrot.lane.b32.xlu0 %v2723_v11, %s2591_s27 }
  0x5d   :  { %214 = vrot.lane.b32.xlu1 %v2721_v10, %s2591_s27  ;;  %208 = vrot.lane.b32.xlu0 %v2715_v9, %s2591_s27 }
  0x61   :  { %225 = vrot.lane.b32.xlu1 %v2711_v8, %s2592_s28  ;;  %223 = vrot.lane.b32.xlu0 %v2723_v11, %s2592_s28 }
  0x65   :  { %227 = vrot.lane.b32.xlu1 %v2721_v10, %s2592_s28  ;;  %221 = vrot.lane.b32.xlu0 %v2715_v9, %s2592_s28 }
  0x69   :  { %238 = vrot.lane.b32.xlu1 %v2711_v8, %s2594_s29  ;;  %236 = vrot.lane.b32.xlu0 %v2723_v11, %s2594_s29 }
  0x6d   :  { %240 = vrot.lane.b32.xlu1 %v2721_v10, %s2594_s29  ;;  %234 = vrot.lane.b32.xlu0 %v2715_v9, %s2594_s29 }
  0x71   :  { %552 = vperm.xlu0 %2466, %v110_v14  }
  0xa3   :  { %v161_v15 = vpop.permute.xlu1 %160  ;;  %v157_v16 = vpop.permute.xlu0 %156 }
  0xa7   :  { %v163_v17 = vpop.permute.xlu1 %162  ;;  %v159_v18 = vpop.permute.xlu0 %158 }
  0xa8   :  { %v167_v34 = vsel %vm164_vm0, %v157_v16, %v159_v18  ;;  %v165_v37 = vsel %vm164_vm0, %v161_v15, %v163_v17  ;;  %v168_v38 = vsel %vm164_vm0, %v163_v17, %v157_v16  ;;  %v166_v43 = vsel %vm164_vm0, %v159_v18, %v161_v15 }
  0xa9   :  { %v252_v41 = vrot.slane %v167_v34, 7  ;;  %v251_v44 = vrot.slane %v168_v38, 7  ;;  %v254_v45 = vrot.slane %v165_v37, 7  ;;  %v253_v54 = vrot.slane %v166_v43, 7 }
  0xab   :  { %v172_v19 = vpop.permute.xlu1 %171  ;;  %v170_v20 = vpop.permute.xlu0 %169 }
  0xac   :  { %v180_v42 = vsel %vm177_vm3, %v170_v20, %v172_v19 }
  0xad   :  { %v264_v50 = vrot.slane %v180_v42, 6 }
  0xaf   :  { %v144_v21 = vpop.permute.xlu1 %143  ;;  %v142_v22 = vpop.permute.xlu0 %141 }
  0xb0   :  { %v154_v39 = vsel %vm151_vm1, %v142_v22, %v144_v21 }
  0xb1   :  { %v321_v46 = vsel %vm319_vm4, %v154_v39, %v252_v41 }
  0xb2   :  { %v326_v58 = vsel %vm324_vm5, %v321_v46, %v264_v50 }
  0xb3   :  { %v176_v23 = vpop.permute.xlu1 %175  ;;  %v174_v24 = vpop.permute.xlu0 %173 }
  0xb4   :  { %v181_v55 = vsel %vm177_vm3, %v176_v23, %v170_v20  ;;  %v179_v56 = vsel %vm177_vm3, %v172_v19, %v174_v24  ;;  %v178_v59 = vsel %vm177_vm3, %v174_v24, %v176_v23 }
  0xb5   :  { %v263_v7 = vrot.slane %v181_v55, 6  ;;  %v265_v13 = vrot.slane %v179_v56, 6  ;;  %v266_v16 = vrot.slane %v178_v59, 6  ;;  %v82_v59 = vld [vmem:[#allocation5 + $0x8] sm:$0xff] }
  0xb7   :  { %v185_v25 = vpop.permute.xlu1 %184  ;;  %v183_v26 = vpop.permute.xlu0 %182 }
  0xb8   :  { %v193_v40 = vsel %vm190_vm2, %v183_v26, %v185_v25 }
  0xb9   :  { %v276_v47 = vrot.slane %v193_v40, 5 }
  0xbb   :  { %v148_v27 = vpop.permute.xlu1 %147  ;;  %v146_v28 = vpop.permute.xlu0 %145  ;;  %v331_v62 = vsel %vm329_vm6, %v326_v58, %v276_v47 }
  0xbc   :  { %v155_v51 = vsel %vm151_vm1, %v148_v27, %v142_v22  ;;  %v153_v52 = vsel %vm151_vm1, %v144_v21, %v146_v28  ;;  %v152_v57 = vsel %vm151_vm1, %v146_v28, %v148_v27  ;;  %v336_v21 = vsel %vm334_vm7, %v331_v62, %v2723_v11 }
  0xbd   :  { %v320_v63 = vsel %vm319_vm4, %v155_v51, %v251_v44  ;;  %v322_v0 = vsel %vm319_vm4, %v153_v52, %v253_v54  ;;  %v323_v14 = vsel %vm319_vm4, %v152_v57, %v254_v45 }
  0xbe   :  { %v325_v19 = vsel %vm324_vm5, %v320_v63, %v263_v7  ;;  %v327_v20 = vsel %vm324_vm5, %v322_v0, %v265_v13  ;;  %v328_v23 = vsel %vm324_vm5, %v323_v14, %v266_v16  ;;  %v81_v13 = vld [vmem:[#allocation5] sm:$0xff]  ;;  %vm2899_vm5 = vmpackc.low %vm319_vm4, %vm2596_vm15  ;;  %vm362_vm4 = vcmask 72704  }
  0xbf   :  { %v189_v30 = vpop.permute.xlu1 %188  ;;  %v187_v31 = vpop.permute.xlu0 %186 }
  0xc0   :  { %v194_v53 = vsel %vm190_vm2, %v189_v30, %v183_v26  ;;  %v191_v60 = vsel %vm190_vm2, %v187_v31, %v189_v30  ;;  %v192_v61 = vsel %vm190_vm2, %v185_v25, %v187_v31 }
  0xc1   :  { %v275_v3 = vrot.slane %v194_v53, 5  ;;  %v277_v17 = vrot.slane %v192_v61, 5  ;;  %v278_v18 = vrot.slane %v191_v60, 5  ;;  %v86_v60 = vld [vmem:[#allocation5 + $0x28] sm:$0x1] }
  0xc3   :  { %v2794_v32 = vpop.permute.xlu1 %199  ;;  %v2796_v33 = vpop.permute.xlu0 %197  ;;  %v330_v24 = vsel %vm329_vm6, %v325_v19, %v275_v3  ;;  %v332_v38 = vsel %vm329_vm6, %v327_v20, %v277_v17  ;;  %v333_v39 = vsel %vm329_vm6, %v328_v23, %v278_v18  ;;  %v87_v17 = vld [vmem:[#allocation5 + $0x30] sm:$0x1]  ;;  %v84_v20 = vld [vmem:[#allocation5 + $0x18] sm:$0xff]  ;;  %v85_v23 = vld [vmem:[#allocation5 + $0x20] sm:$0x1]  ;;  %vm889_vm6 = vcmask 293888  }
  0xc4   :  { %v205_v15 = vsel %vm203_vm8, %v2796_v33, %v2794_v32  ;;  %v338_v56 = vsel %vm334_vm7, %v333_v39, %v2721_v10  ;;  %v337_v62 = vsel %vm334_vm7, %v332_v38, %v2711_v8 }
  0xc5   :  { %v288_v25 = vrot.slane %v205_v15, 3 }
  0xc7   :  { %v202_v35 = vpop.permute.xlu1 %201  ;;  %v196_v36 = vpop.permute.xlu0 %195  ;;  %v341_v42 = vsel %vm339_vm11, %v336_v21, %v288_v25  ;;  %v88_v25 = vld [vmem:[#allocation5 + $0x38] sm:$0x1] }
  0xc8   :  { %v206_v26 = vsel %vm203_vm8, %v196_v36, %v2796_v33  ;;  %v204_v30 = vsel %vm203_vm8, %v2794_v32, %v202_v35  ;;  %v207_v31 = vsel %vm203_vm8, %v202_v35, %v196_v36  ;;  %v335_v32 = vsel %vm334_vm7, %v330_v24, %v2715_v9 }
  0xc9   :  { %v287_v41 = vrot.slane %v206_v26, 3  ;;  %v289_v43 = vrot.slane %v204_v30, 3  ;;  %v290_v44 = vrot.slane %v207_v31, 3 }
  0xcb   :  { %v213_v48 = vpop.permute.xlu1 %212  ;;  %v211_v49 = vpop.permute.xlu0 %210  ;;  %v340_v57 = vsel %vm339_vm11, %v335_v32, %v287_v41  ;;  %v343_v63 = vsel %vm339_vm11, %v338_v56, %v290_v44  ;;  %v109_v44 = vld [vmem:[%s3866_s3] sm:$0xf] }
  0xcc   :  { %v218_v22 = vsel %vm216_vm9, %v211_v49, %v213_v48 }
  0xcd   :  { %v300_v33 = vrot.slane %v218_v22, 2  ;;  %v83_v22 = vld [vmem:[#allocation5 + $0x10] sm:$0xff] }
  0xcf   :  { %v215_v5 = vpop.permute.xlu1 %214  ;;  %v209_v6 = vpop.permute.xlu0 %208  ;;  %v346_v55 = vsel %vm344_vm12, %v341_v42, %v300_v33 }
  0xd0   :  { %v219_v34 = vsel %vm216_vm9, %v209_v6, %v211_v49  ;;  %v220_v40 = vsel %vm216_vm9, %v215_v5, %v209_v6  ;;  %v217_v35 = vsel %vm216_vm9, %v213_v48, %v215_v5  ;;  %v342_v6 = vsel %vm339_vm11, %v337_v62, %v289_v43  ;;  %v117_v43 = vld [vmem:[%s3874_s11] sm:$0x3] }
  0xd1   :  { %v299_v45 = vrot.slane %v219_v34, 2  ;;  %v302_v49 = vrot.slane %v220_v40, 2  ;;  %v301_v53 = vrot.slane %v217_v35, 2  ;;  %v112_v62 = vld [vmem:[%s3869_s6] sm:$0xf] }
  0xd3   :  { %v226_v27 = vpop.permute.xlu1 %225  ;;  %v224_v28 = vpop.permute.xlu0 %223  ;;  %v345_v0 = vsel %vm344_vm12, %v340_v57, %v299_v45  ;;  %v348_v15 = vsel %vm344_vm12, %v343_v63, %v302_v49  ;;  %v347_v16 = vsel %vm344_vm12, %v342_v6, %v301_v53 }
  0xd4   :  { %v231_v37 = vsel %vm229_vm10, %v224_v28, %v226_v27 }
  0xd5   :  { %v312_v36 = vrot.slane %v231_v37, 1 }
  0xd7   :  { %v228_v46 = vpop.permute.xlu1 %227  ;;  %v222_v47 = vpop.permute.xlu0 %221  ;;  %v351_v61 = vsel %vm349_vm13, %v346_v55, %v312_v36 }
  0xd8   :  { %v230_v50 = vsel %vm229_vm10, %v226_v27, %v228_v46  ;;  %v232_v51 = vsel %vm229_vm10, %v222_v47, %v224_v28  ;;  %v233_v52 = vsel %vm229_vm10, %v228_v46, %v222_v47  ;;  %v355_v18 = vmul.f32 %v351_v61, %v82_v59 }
  0xd9   :  { %v311_v48 = vrot.slane %v232_v51, 1  ;;  %v314_v54 = vrot.slane %v233_v52, 1  ;;  %v313_v58 = vrot.slane %v230_v50, 1 }
  0xdb   :  { %v239_v3 = vpop.permute.xlu1 %238  ;;  %v237_v5 = vpop.permute.xlu0 %236  ;;  %v350_v14 = vsel %vm349_vm13, %v345_v0, %v311_v48  ;;  %v353_v21 = vsel %vm349_vm13, %v348_v15, %v314_v54  ;;  %v352_v26 = vsel %vm349_vm13, %v347_v16, %v313_v58 }
  0xdc   :  { %v244_v7 = vsel %vm242_vm14, %v237_v5, %v239_v3  ;;  %v354_v31 = vmul.f32 %v350_v14, %v81_v13  ;;  %v357_v39 = vmul.f32 %v353_v21, %v84_v20  ;;  %v356_v41 = vmul.f32 %v352_v26, %v83_v22 }
  0xdd   :  { %v359_v19 = vmul.f32 %v244_v7, %v86_v60 }
  0xdf   :  { %v241_v27 = vpop.permute.xlu1 %240  ;;  %v235_v28 = vpop.permute.xlu0 %234  ;;  %v2361_v30 = vpack.c.bf16 %v359_v19, %v355_v18 }
  0xe0   :  { %v243_v34 = vsel %vm242_vm14, %v239_v3, %v241_v27  ;;  %v245_v37 = vsel %vm242_vm14, %v235_v28, %v237_v5  ;;  %v246_v38 = vsel %vm242_vm14, %v241_v27, %v235_v28 }
  0xe1   :  { %v360_v33 = vmul.f32 %v243_v34, %v87_v17  ;;  %v358_v40 = vmul.f32 %v245_v37, %v85_v23  ;;  %2363 = vmatprep.subr.msk.bf16.mxu0 %vm2899_vm5, %v2361_v30  ;;  %v361_v32 = vmul.f32 %v246_v38, %v88_v25  ;;  %v3039_v38 = vld [vmem:[#allocation8] sm:$0xff] }
  0xe3   :  { %v2364_v35 = vpack.c.bf16 %v358_v40, %v354_v31  ;;  %v2367_v36 = vpack.c.bf16 %v361_v32, %v357_v39  ;;  %v2370_v42 = vpack.c.bf16 %v360_v33, %v356_v41 }
  0xe5   :  { %2366 = vmatpush1.bf16.msk.msra.mxu0 %vm2899_vm5, %v2364_v35  ;;  %2369 = vmatprep.subr.msk.bf16.mxu1 %vm2899_vm5, %v2367_v36 }
  0xe6   :  { %2372 = vmatpush1.bf16.msk.msra.mxu1 %vm2899_vm5, %v2370_v42  ;;  %2375 = vmatprep.subr.msk.bf16.mxu0 %vm2899_vm5, %v2361_v30 }
  0xe7   :  { %2381 = vmatprep.subr.msk.bf16.mxu1 %vm2899_vm5, %v2367_v36  ;;  %v3050_v36 = vld [vmem:[#allocation8 + $0x18] sm:$0xff] }
  0xe8   :  { %2323 = vmatmul.mubr.msk.f32.vlgmr.msra.gmra.mrb[0].mxu0 %vm362_vm4, %v117_v43 }
  0xe9   :  { %2326 = vmatmul.mubr.msk.f32.vlgmr.msra.gmra.mrb[0].mxu1 %vm362_vm4, %v117_v43  ;;  %2378 = vmatpush1.bf16.msk.msra.mxu0 %vm2899_vm5, %v2364_v35 }
  0xea   :  { %2384 = vmatpush1.bf16.msk.msra.mxu1 %vm2899_vm5, %v2370_v42  ;;  %622 = vmatprep.mubr.f32.mxu0 %v3880_v12 }
  0xeb   :  { %693 = vmatprep.mubr.f32.mxu1 %v3880_v12 }
  0xec   :  { %2329 = vmatmul.mubr.msk.f32.vlgmr.msra.gmra.mrb[2].mxu0 %vm362_vm4, %v109_v44 }
  0xed   :  { %2332 = vmatmul.mubr.msk.f32.vlgmr.msra.gmra.mrb[2].mxu1 %vm362_vm4, %v109_v44  ;;  %969 = vmatprep.mubr.f32.mxu0 %v3880_v12 }
  0xee   :  { %1040 = vmatprep.mubr.f32.mxu1 %v3880_v12 }
  0xf0   :  { %v553_v50 = vpop.permute.xlu0 %552 }
 0x1bb   :  { %v2936_v45 = vpop.f32.mrb[0].mxu0 }
 0x1bc   :  { %v2938_v46 = vpop.f32.mrb[1].mxu0  ;;  %v2940_v47 = vpop.f32.mrb[0].mxu1 }
 0x1bd   :  { %v2942_v49 = vpop.f32.mrb[1].mxu1 }
 0x1bf   :  { %v624_v51 = vpop.f32.mrb[2].mxu0 }
 0x1c0   :  { %v625_v52 = vadd.f32 %v624_v51, %v553_v50  ;;  %v626_v53 = vpop.f32.mrb[3].mxu0  ;;  %v695_v48 = vpop.f32.mrb[2].mxu1 }
 0x1c1   :  { %v697_v54 = vpop.f32.mrb[3].mxu1  ;;  %v696_v56 = vadd.f32 %v695_v48, %v553_v50  ;;  %v627_v60 = vadd.f32 %v626_v53, %v553_v50 }
 0x1c2   :  { %v2944_v55 = vmax.f32 %v625_v52, 0.0  ;;  %v698_v58 = vadd.f32 %v697_v54, %v553_v50 }
 0x1c3   :  { %v2950_v57 = vmax.f32 %v696_v56, 0.0  ;;  %v2982_v61 = vmax.f32 %v627_v60, 0.0 }
 0x1c4   :  { %740 = vrot.lane.b32.xlu0 %v2944_v55, %s2589_s25  ;;  %716 = vrot.lane.b32.xlu1 %v2944_v55, %s2586_s2  ;;  %v2968_v59 = vmax.f32 %v698_v58, 0.0 }
 0x1c8   :  { %704 = vrot.lane.b32.xlu0 %v2944_v55, %s2588_s24  ;;  %720 = vrot.lane.b32.xlu1 %v2950_v57, %s2586_s2 }
 0x1cc   :  { %728 = vrot.lane.b32.xlu0 %v2944_v55, %s2587_s0  ;;  %744 = vrot.lane.b32.xlu1 %v2950_v57, %s2589_s25 }
 0x1d0   :  { %708 = vrot.lane.b32.xlu0 %v2950_v57, %s2588_s24  ;;  %756 = vrot.lane.b32.xlu1 %v2950_v57, %s2590_s26 }
 0x1d4   :  { %752 = vrot.lane.b32.xlu0 %v2944_v55, %s2590_s26  ;;  %780 = vrot.lane.b32.xlu1 %v2950_v57, %s2592_s28 }
 0x1d8   :  { %722 = vrot.lane.b32.xlu0 %v2968_v59, %s2586_s2  ;;  %732 = vrot.lane.b32.xlu1 %v2950_v57, %s2587_s0 }
 0x1dc   :  { %710 = vrot.lane.b32.xlu0 %v2968_v59, %s2588_s24  ;;  %776 = vrot.lane.b32.xlu1 %v2944_v55, %s2592_s28 }
 0x1e0   :  { %734 = vrot.lane.b32.xlu0 %v2968_v59, %s2587_s0  ;;  %768 = vrot.lane.b32.xlu1 %v2950_v57, %s2591_s27 }
 0x1e4   :  { %754 = vrot.lane.b32.xlu0 %v2982_v61, %s2590_s26  ;;  %718 = vrot.lane.b32.xlu1 %v2982_v61, %s2586_s2 }
 0x1e8   :  { %778 = vrot.lane.b32.xlu0 %v2982_v61, %s2592_s28  ;;  %742 = vrot.lane.b32.xlu1 %v2982_v61, %s2589_s25 }
 0x1ec   :  { %766 = vrot.lane.b32.xlu0 %v2982_v61, %s2591_s27  ;;  %746 = vrot.lane.b32.xlu1 %v2968_v59, %s2589_s25 }
 0x1f0   :  { %758 = vrot.lane.b32.xlu0 %v2968_v59, %s2590_s26  ;;  %706 = vrot.lane.b32.xlu1 %v2982_v61, %s2588_s24 }
 0x1f4   :  { %782 = vrot.lane.b32.xlu0 %v2968_v59, %s2592_s28  ;;  %730 = vrot.lane.b32.xlu1 %v2982_v61, %s2587_s0 }
 0x1f8   :  { %790 = vrot.lane.b32.xlu0 %v2982_v61, %s2594_s29  ;;  %764 = vrot.lane.b32.xlu1 %v2944_v55, %s2591_s27 }
 0x1fc   :  { %788 = vrot.lane.b32.xlu0 %v2944_v55, %s2594_s29  ;;  %770 = vrot.lane.b32.xlu1 %v2968_v59, %s2591_s27 }
 0x200   :  { %886 = vperm.xlu0 %2466, %v112_v62   ;;  %792 = vrot.lane.b32.xlu1 %v2950_v57, %s2594_s29 }
 0x204   :  { %794 = vrot.lane.b32.xlu1 %v2968_v59, %s2594_s29 }
 0x236   :  { %v741_v63 = vpop.permute.xlu0 %740  ;;  %v717_v0 = vpop.permute.xlu1 %716 }
 0x23a   :  { %v705_v3 = vpop.permute.xlu0 %704  ;;  %v721_v5 = vpop.permute.xlu1 %720 }
 0x23e   :  { %v3019_v6 = vpop.permute.xlu0 %728  ;;  %v745_v7 = vpop.permute.xlu1 %744 }
 0x242   :  { %v709_v13 = vpop.permute.xlu0 %708  ;;  %v757_v14 = vpop.permute.xlu1 %756 }
 0x246   :  { %v3021_v15 = vpop.permute.xlu0 %752  ;;  %v3023_v16 = vpop.permute.xlu1 %780 }
 0x24a   :  { %v723_v17 = vpop.permute.xlu0 %722  ;;  %v3025_v18 = vpop.permute.xlu1 %732 }
 0x24b   :  { %v727_v25 = vsel %vm164_vm0, %v723_v17, %v717_v0  ;;  %v724_v26 = vsel %vm164_vm0, %v721_v5, %v723_v17 }
 0x24c   :  { %v804_v31 = vrot.slane %v727_v25, 4  ;;  %v807_v37 = vrot.slane %v724_v26, 4 }
 0x24e   :  { %v711_v19 = vpop.permute.xlu0 %710  ;;  %v3027_v20 = vpop.permute.xlu1 %776 }
 0x24f   :  { %v715_v27 = vsel %vm151_vm1, %v711_v19, %v705_v3  ;;  %v712_v34 = vsel %vm151_vm1, %v709_v13, %v711_v19 }
 0x250   :  { %v848_v39 = vsel %vm334_vm7, %v715_v27, %v804_v31  ;;  %v851_v32 = vsel %vm334_vm7, %v712_v34, %v807_v37 }
 0x251   :  { %v3061_v51 = vmul.f32 %v848_v39, %v3039_v38  ;;  %v867_v60 = vmul.f32 %v851_v32, %v3050_v36  ;;  %v3095_v39 = vld [vmem:[#allocation8 + $0x20] sm:$0xff] }
 0x252   :  { %v735_v21 = vpop.permute.xlu0 %734  ;;  %v3029_v22 = vpop.permute.xlu1 %768 }
 0x253   :  { %v736_v54 = vsel %vm177_vm3, %v3025_v18, %v735_v21  ;;  %v739_v56 = vsel %vm177_vm3, %v735_v21, %v3019_v6 }
 0x256   :  { %v755_v23 = vpop.permute.xlu0 %754  ;;  %v719_v24 = vpop.permute.xlu1 %718 }
 0x257   :  { %v761_v33 = vsel %vm203_vm8, %v755_v23, %v757_v14  ;;  %v762_v40 = vsel %vm203_vm8, %v3021_v15, %v755_v23  ;;  %v725_v42 = vsel %vm164_vm0, %v719_v24, %v721_v5  ;;  %v726_v43 = vsel %vm164_vm0, %v717_v0, %v719_v24  ;;  %v3073_v23 = vld [vmem:[#allocation8 + $0x38] sm:$0xff] }
 0x258   :  { %v828_v52 = vrot.slane %v762_v40, 4  ;;  %v829_v53 = vrot.slane %v761_v33, 4  ;;  %v805_v62 = vrot.slane %v726_v43, 4  ;;  %v806_v0 = vrot.slane %v725_v42, 4  ;;  %v3104_v43 = vld [vmem:[#allocation8 + $0x30] sm:$0xff] }
 0x25a   :  { %v779_v28 = vpop.permute.xlu0 %778  ;;  %v743_v30 = vpop.permute.xlu1 %742  ;;  %v856_v31 = vsel %vm334_vm7, %v2944_v55, %v828_v52 }
 0x25b   :  { %v785_v5 = vsel %vm229_vm10, %v779_v28, %v3023_v16  ;;  %v786_v25 = vsel %vm229_vm10, %v3027_v20, %v779_v28  ;;  %v749_v21 = vsel %vm190_vm2, %v743_v30, %v745_v7  ;;  %v750_v26 = vsel %vm190_vm2, %v741_v63, %v743_v30 }
 0x25c   :  { %v841_v37 = vrot.slane %v785_v5, 4  ;;  %v840_v33 = vrot.slane %v786_v25, 4  ;;  %v817_v40 = vrot.slane %v750_v26, 4  ;;  %v818_v32 = vrot.slane %v749_v21, 4  ;;  %v3130_v25 = vld [vmem:[#allocation8 + $0x40] sm:$0xff] }
 0x25e   :  { %v3048_v41 = vpop.permute.xlu0 %766  ;;  %v747_v35 = vpop.permute.xlu1 %746 }
 0x25f   :  { %v748_v44 = vsel %vm190_vm2, %v745_v7, %v747_v35  ;;  %v751_v50 = vsel %vm190_vm2, %v747_v35, %v741_v63  ;;  %v773_v34 = vsel %vm216_vm9, %v3048_v41, %v3029_v22  ;;  %v857_v7 = vsel %vm334_vm7, %v2982_v61, %v829_v53  ;;  %v3101_v35 = vld [vmem:[#allocation8 + $0x10] sm:$0xff] }
 0x260   :  { %v819_v48 = vrot.slane %v748_v44, 4  ;;  %v816_v58 = vrot.slane %v751_v50, 4  ;;  %v861_v50 = vsel %vm334_vm7, %v773_v34, %v841_v37 }
 0x262   :  { %v759_v17 = vpop.permute.xlu0 %758  ;;  %v707_v19 = vpop.permute.xlu1 %706  ;;  %v855_v24 = vsel %vm334_vm7, %v736_v54, %v819_v48  ;;  %v852_v63 = vsel %vm334_vm7, %v739_v56, %v816_v58  ;;  %v3114_v48 = vld [vmem:[#allocation8 + $0x8] sm:$0xff] }
 0x263   :  { %v713_v27 = vsel %vm151_vm1, %v707_v19, %v709_v13  ;;  %v714_v28 = vsel %vm151_vm1, %v705_v3, %v707_v19  ;;  %v760_v13 = vsel %vm203_vm8, %v757_v14, %v759_v17  ;;  %v871_v30 = vmul.f32 %v855_v24, %v3073_v23  ;;  %v3116_v54 = vld [vmem:[#allocation8 + $0x28] sm:$0xff] }
 0x264   :  { %v850_v3 = vsel %vm334_vm7, %v713_v27, %v806_v0  ;;  %v763_v52 = vsel %vm203_vm8, %v759_v17, %v3021_v15  ;;  %v849_v14 = vsel %vm334_vm7, %v714_v28, %v805_v62  ;;  %v3118_v56 = vld [vmem:[#allocation8 + $0x68] sm:$0xff]  ;;  %v868_v58 = vmul.f32 %v852_v63, %v3095_v39  ;;  %v3132_v27 = vld [vmem:[#allocation8 + $0x60] sm:$0xff] }
 0x265   :  { %v830_v0 = vrot.slane %v760_v13, 4  ;;  %v866_v62 = vmul.f32 %v850_v3, %v3101_v35  ;;  %v2393_v19 = vpack.c.bf16 %v871_v30, %v867_v60  ;;  %v3128_v24 = vld [vmem:[#allocation8 + $0x48] sm:$0xff]  ;;  %v831_v21 = vrot.slane %v763_v52, 4 }
 0x266   :  { %v783_v42 = vpop.permute.xlu0 %782  ;;  %v731_v44 = vpop.permute.xlu1 %730  ;;  %v877_v37 = vmul.f32 %v861_v50, %v3118_v56  ;;  %v873_v3 = vmul.f32 %v857_v7, %v3128_v24  ;;  %v3149_v50 = vld [vmem:[#allocation8 + $0x50] sm:$0xff]  ;;  %v3157_v7 = vld [vmem:[#allocation8 + $0x58] sm:$0xff] }
 0x267   :  { %v737_v53 = vsel %vm177_vm3, %v731_v44, %v3025_v18  ;;  %v738_v5 = vsel %vm177_vm3, %v3019_v6, %v731_v44  ;;  %v865_v6 = vmul.f32 %v849_v14, %v3114_v48  ;;  %v784_v63 = vsel %vm229_vm10, %v3023_v16, %v783_v42  ;;  %2394 = vmatprep.subr.bf16.mxu1 %v2393_v19  ;;  %v3155_v14 = vld [vmem:[#allocation8 + $0x70] sm:$0xff] }
 0x268   :  { %v854_v15 = vsel %vm334_vm7, %v737_v53, %v818_v32  ;;  %v853_v17 = vsel %vm334_vm7, %v738_v5, %v817_v40  ;;  %v787_v60 = vsel %vm229_vm10, %v783_v42, %v3027_v20  ;;  %v872_v44 = vmul.f32 %v856_v31, %v3130_v25  ;;  %v3159_v31 = vld [vmem:[#allocation8 + $0x78] sm:$0xff] }
 0x269   :  { %v870_v18 = vmul.f32 %v854_v15, %v3104_v43  ;;  %v869_v28 = vmul.f32 %v853_v17, %v3116_v54  ;;  %v858_v16 = vsel %vm334_vm7, %v2950_v57, %v830_v0  ;;  %v2387_v42 = vpack.c.bf16 %v868_v58, %v3061_v51 }
 0x26a   :  { %v791_v26 = vpop.permute.xlu0 %790  ;;  %v765_v34 = vpop.permute.xlu1 %764  ;;  %v842_v52 = vrot.slane %v784_v63, 4  ;;  %v2389_v53 = vpack.c.bf16 %v877_v37, %v873_v3  ;;  %v859_v5 = vsel %vm334_vm7, %v2968_v59, %v831_v21  ;;  %v3172_v21 = vld [vmem:[#allocation8 + $0x88] sm:$0xf]  ;;  %v3186_v3 = vld [vmem:[#allocation8 + $0x98] sm:$0xf] }
 0x26b   :  { %v774_v13 = vsel %vm216_vm9, %v765_v34, %v3048_v41  ;;  %v2395_v30 = vpack.c.bf16 %v870_v18, %v866_v62  ;;  %v2385_v32 = vpack.c.bf16 %v869_v28, %v865_v6  ;;  %v843_v41 = vrot.slane %v787_v60, 4 }
 0x26c   :  { %v860_v40 = vsel %vm334_vm7, %v774_v13, %v840_v33  ;;  %v874_v18 = vmul.f32 %v858_v16, %v3149_v50  ;;  %v875_v6 = vmul.f32 %v859_v5, %v3157_v7 }
 0x26d   :  { %v876_v20 = vmul.f32 %v860_v40, %v3132_v27  ;;  %2396 = vmatpush1.bf16.msra.mxu1 %v2395_v30  ;;  %2386 = vmatprep.subr.bf16.mxu0 %v2385_v32  ;;  %v3183_v40 = vld [vmem:[#allocation8 + $0x90] sm:$0xf] }
 0x26e   :  { %v771_v33 = vpop.permute.xlu1 %770  ;;  %v789_v0 = vpop.permute.xlu0 %788  ;;  %2388 = vmatpush1.bf16.msra.mxu0 %v2387_v42 }
 0x26f   :  { %v772_v51 = vsel %vm216_vm9, %v3029_v22, %v771_v33  ;;  %v775_v58 = vsel %vm216_vm9, %v771_v33, %v765_v34  ;;  %v2391_v15 = vpack.c.bf16 %v876_v20, %v872_v44  ;;  %2390 = vmatprep.subr.bf16.mxu0 %v2389_v53  ;;  %v3176_v22 = vld [vmem:[#allocation8 + $0x80] sm:$0xf]  ;;  %v798_v34 = vsel %vm242_vm14, %v789_v0, %v791_v26 }
 0x270   :  { %v862_v62 = vsel %vm334_vm7, %v772_v51, %v842_v52  ;;  %v863_v17 = vsel %vm334_vm7, %v775_v58, %v843_v41  ;;  %v880_v32 = vmul.f32 %v798_v34, %v3176_v22  ;;  %v3191_v44 = vld [vmem:[%s3868_s5] sm:$0xf] }
 0x271   :  { %v878_v19 = vmul.f32 %v862_v62, %v3155_v14  ;;  %v879_v28 = vmul.f32 %v863_v17, %v3159_v31 }
 0x272   :  { %v793_v37 = vpop.permute.xlu1 %792  ;;  %2392 = vmatpush1.bf16.msra.mxu0 %v2391_v15 }
 0x273   :  { %v797_v63 = vsel %vm242_vm14, %v791_v26, %v793_v37  ;;  %v2397_v60 = vpack.c.bf16 %v879_v28, %v875_v6  ;;  %v2399_v13 = vpack.c.bf16 %v878_v19, %v874_v18 }
 0x274   :  { %v881_v30 = vmul.f32 %v797_v63, %v3172_v21 }
 0x275   :  { %2398 = vmatprep.subr.bf16.mxu1 %v2397_v60 }
 0x276   :  { %2333 = vmatprep.subr.msk.mxu0 %vm334_vm7, %v881_v30  ;;  %2400 = vmatpush1.bf16.msra.mxu1 %v2399_v13  ;;  %v795_v26 = vpop.permute.xlu1 %794 }
 0x277   :  { %v796_v16 = vsel %vm242_vm14, %v793_v37, %v795_v26  ;;  %v799_v20 = vsel %vm242_vm14, %v795_v26, %v789_v0  ;;  %2334 = vmatpush1.msk.msra.mxu0 %vm334_vm7, %v880_v32 }
 0x278   :  { %v882_v42 = vmul.f32 %v796_v16, %v3183_v40  ;;  %v883_v52 = vmul.f32 %v799_v20, %v3186_v3  ;;  %2335 = vmatmul.mubr.msk.f32.vlgmr.msra.gmra.mrb[4].mxu0 %vm889_vm6, %v3191_v44 }
 0x279   :  { %1367 = vmatprep.mubr.f32.mxu0 %v3880_v12 }
 0x27a   :  { %2336 = vmatprep.subr.msk.mxu1 %vm334_vm7, %v883_v52 }
 0x27b   :  { %2337 = vmatpush1.msk.msra.mxu1 %vm334_vm7, %v882_v42 }
 0x27c   :  { %2338 = vmatmul.mubr.msk.f32.vlgmr.msra.gmra.mrb[4].mxu1 %vm889_vm6, %v3191_v44 }
 0x27d   :  { %1438 = vmatprep.mubr.f32.mxu1 %v3880_v12 }
 0x27f   :  { %v3209_v41 = vpop.permute.xlu0 %886 }
 0x34b   :  { %v971_v33 = vpop.f32.mrb[4].mxu0 }
 0x34c   :  { %v972_v53 = vadd.f32 %v971_v33, %v3209_v41  ;;  %v973_v5 = vpop.f32.mrb[5].mxu0 }
 0x34d   :  { %v974_v0 = vadd.f32 %v973_v5, %v3209_v41  ;;  %v114_v5 = vld [vmem:[%s3871_s8] sm:$0xf] }
 0x34e   :  { %v1047_v51 = vsel %vm334_vm7, %v972_v53, 0.0  ;;  %v1058_v58 = vmul.f32 %v972_v53, %v972_v53 }
 0x34f   :  { %v1048_v15 = vsel %vm334_vm7, %v974_v0, 0.0  ;;  %v1059_v62 = vmul.f32 %v974_v0, %v974_v0  ;;  %v1042_v17 = vpop.f32.mrb[4].mxu1 }
 0x350   :  { %v1043_v18 = vadd.f32 %v1042_v17, %v3209_v41  ;;  %v1044_v19 = vpop.f32.mrb[5].mxu1  ;;  %v1049_v6 = vadd.f32 %v1048_v15, %v1047_v51  ;;  %v1062_v28 = vsel %vm334_vm7, %v1058_v58, 0.0  ;;  %v113_v51 = vld [vmem:[%s3870_s7] sm:$0xf] }
 0x351   :  { %v1045_v34 = vadd.f32 %v1044_v19, %v3209_v41  ;;  %v1063_v37 = vsel %vm334_vm7, %v1059_v62, 0.0 }
 0x352   :  { %v1060_v63 = vmul.f32 %v1043_v18, %v1043_v18  ;;  %v1050_v60 = vsel %vm334_vm7, %v1043_v18, 0.0  ;;  %v1064_v13 = vadd.f32 %v1063_v37, %v1062_v28 }
 0x353   :  { %v1051_v30 = vadd.f32 %v1050_v60, %v1049_v6  ;;  %v1052_v32 = vsel %vm334_vm7, %v1045_v34, 0.0  ;;  %v1061_v26 = vmul.f32 %v1045_v34, %v1045_v34 }
 0x354   :  { %v1065_v16 = vsel %vm334_vm7, %v1060_v63, 0.0 }
 0x355   :  { %v1053_v20 = vadd.f32 %v1052_v32, %v1051_v30  ;;  %v1066_v42 = vadd.f32 %v1065_v16, %v1064_v13  ;;  %v1067_v52 = vsel %vm334_vm7, %v1061_v26, 0.0 }
 0x357   :  { %1054 = vadd.xlane.f32.xlu1 %v1053_v20  ;;  %v1068_v33 = vadd.f32 %v1067_v52, %v1066_v42 }
 0x359   :  { %1069 = vadd.xlane.f32.xlu0 %v1068_v33 }
 0x368   :  { %1096 = vperm.xlu1 %2467, %v114_v5  }
 0x36f   :  { %1087 = vperm.xlu0 %2466, %v113_v51  }
 0x3e4   :  { %v1055_v58 = vpop.xlane.xlu1 %1054 }
 0x3e5   :  { %v1057_v15 = vmul.f32 0.001953125, %v1055_v58 }
 0x3e6   :  { %v1070_v62 = vpop.xlane.xlu0 %1069 }
 0x3e7   :  { %v1071_v17 = vmul.f32 0.001953125, %v1070_v62  ;;  %v1072_v19 = vmul.f32 %v1057_v15, %v1057_v15  ;;  %v1075_v63 = vsub.f32 %v972_v53, %v1057_v15  ;;  %v1076_v60 = vsub.f32 %v974_v0, %v1057_v15 }
 0x3e8   :  { %v1078_v13 = vsub.f32 %v1045_v34, %v1057_v15  ;;  %v3231_v42 = vpop.permute.xlu1 %1096 }
 0x3e9   :  { %v1073_v6 = vsub.f32 %v1071_v17, %v1072_v19  ;;  %v1077_v19 = vsub.f32 %v1043_v18, %v1057_v15 }
 0x3eb   :  { %v1074_v28 = vmax.f32 %v1073_v6, 0.0 }
 0x3ed   :  { %v1079_v37 = vadd.f32 1e-05, %v1074_v28 }
 0x3ee   :  { %v3229_v20 = vpop.permute.xlu0 %1087 }
 0x3ef   :  { %2468 = vrsqrt.f32 %v1079_v37 }
 0x3f9   :  { %v2469_v30 = vpop.eup %2468 }
 0x3fa   :  { %v1081_v32 = vmul.f32 %v2469_v30, %v1075_v63  ;;  %v1082_v26 = vmul.f32 %v2469_v30, %v1076_v60  ;;  %v1084_v16 = vmul.f32 %v2469_v30, %v1078_v13  ;;  %v1083_v6 = vmul.f32 %v2469_v30, %v1077_v19 }
 0x3fc   :  { %v1090_v52 = vmul.f32 %v3229_v20, %v1081_v32  ;;  %v1091_v33 = vmul.f32 %v3229_v20, %v1082_v26  ;;  %v1093_v5 = vmul.f32 %v3229_v20, %v1084_v16 }
 0x3fe   :  { %v1099_v51 = vadd.f32 %v3231_v42, %v1090_v52  ;;  %v1100_v53 = vadd.f32 %v3231_v42, %v1091_v33  ;;  %v1102_v58 = vadd.f32 %v3231_v42, %v1093_v5 }
 0x400   :  { %v1103_v0 = vmax.f32 %v1099_v51, 0.0  ;;  %v1104_v34 = vmax.f32 %v1100_v53, 0.0  ;;  %v1106_v28 = vmax.f32 %v1102_v58, 0.0 }
 0x402   :  { %v3240_v62 = vadd.f32 %v1104_v34, %v2982_v61  ;;  %v3243_v17 = vadd.f32 %v1103_v0, %v2944_v55  ;;  %v1092_v61 = vmul.f32 %v3229_v20, %v1083_v6  ;;  %v3255_v55 = vadd.f32 %v1106_v28, %v2968_v59 }
 0x404   :  { %1125 = vrot.lane.b32.xlu0 %v3240_v62, %s2586_s2  ;;  %1123 = vrot.lane.b32.xlu1 %v3243_v17, %s2586_s2  ;;  %v1101_v18 = vadd.f32 %v3231_v42, %v1092_v61 }
 0x406   :  { %v1105_v15 = vmax.f32 %v1101_v18, 0.0 }
 0x408   :  { %1149 = vrot.lane.b32.xlu0 %v3240_v62, %s2589_s25  ;;  %1147 = vrot.lane.b32.xlu1 %v3243_v17, %s2589_s25  ;;  %v3271_v59 = vadd.f32 %v1105_v15, %v2950_v57 }
 0x40c   :  { %1153 = vrot.lane.b32.xlu0 %v3255_v55, %s2589_s25  ;;  %1129 = vrot.lane.b32.xlu1 %v3255_v55, %s2586_s2 }
 0x410   :  { %1113 = vrot.lane.b32.xlu0 %v3240_v62, %s2588_s24  ;;  %1111 = vrot.lane.b32.xlu1 %v3243_v17, %s2588_s24 }
 0x414   :  { %1137 = vrot.lane.b32.xlu0 %v3240_v62, %s2587_s0  ;;  %1135 = vrot.lane.b32.xlu1 %v3243_v17, %s2587_s0 }
 0x418   :  { %1127 = vrot.lane.b32.xlu0 %v3271_v59, %s2586_s2  ;;  %1117 = vrot.lane.b32.xlu1 %v3255_v55, %s2588_s24 }
 0x41c   :  { %1151 = vrot.lane.b32.xlu0 %v3271_v59, %s2589_s25  ;;  %1141 = vrot.lane.b32.xlu1 %v3255_v55, %s2587_s0 }
 0x420   :  { %1163 = vrot.lane.b32.xlu0 %v3271_v59, %s2590_s26  ;;  %1161 = vrot.lane.b32.xlu1 %v3240_v62, %s2590_s26 }
 0x424   :  { %1187 = vrot.lane.b32.xlu0 %v3271_v59, %s2592_s28  ;;  %1185 = vrot.lane.b32.xlu1 %v3240_v62, %s2592_s28 }
 0x428   :  { %1139 = vrot.lane.b32.xlu0 %v3271_v59, %s2587_s0  ;;  %1115 = vrot.lane.b32.xlu1 %v3271_v59, %s2588_s24 }
 0x42c   :  { %1183 = vrot.lane.b32.xlu0 %v3243_v17, %s2592_s28  ;;  %1159 = vrot.lane.b32.xlu1 %v3243_v17, %s2590_s26 }
 0x430   :  { %1175 = vrot.lane.b32.xlu0 %v3271_v59, %s2591_s27  ;;  %1173 = vrot.lane.b32.xlu1 %v3240_v62, %s2591_s27 }
 0x434   :  { %1171 = vrot.lane.b32.xlu0 %v3243_v17, %s2591_s27  ;;  %1165 = vrot.lane.b32.xlu1 %v3255_v55, %s2590_s26 }
 0x438   :  { %1177 = vrot.lane.b32.xlu0 %v3255_v55, %s2591_s27  ;;  %1189 = vrot.lane.b32.xlu1 %v3255_v55, %s2592_s28 }
 0x43c   :  { %1199 = vrot.lane.b32.xlu0 %v3271_v59, %s2594_s29  ;;  %1197 = vrot.lane.b32.xlu1 %v3240_v62, %s2594_s29 }
 0x440   :  { %1201 = vrot.lane.b32.xlu0 %v3255_v55, %s2594_s29  ;;  %1195 = vrot.lane.b32.xlu1 %v3243_v17, %s2594_s29 }
 0x476   :  { %v1126_v57 = vpop.permute.xlu0 %1125  ;;  %v1124_v37 = vpop.permute.xlu1 %1123 }
 0x477   :  { %v1133_v32 = vsel %vm164_vm0, %v1124_v37, %v1126_v57 }
 0x478   :  { %v1212_v5 = vrot.slane %v1133_v32, 4 }
 0x47a   :  { %v1150_v63 = vpop.permute.xlu0 %1149  ;;  %v1148_v60 = vpop.permute.xlu1 %1147 }
 0x47b   :  { %v1157_v52 = vsel %vm190_vm2, %v1148_v60, %v1150_v63 }
 0x47c   :  { %v1224_v51 = vrot.slane %v1157_v52, 4 }
 0x47e   :  { %v1154_v13 = vpop.permute.xlu0 %1153  ;;  %v1130_v30 = vpop.permute.xlu1 %1129 }
 0x47f   :  { %v1134_v6 = vsel %vm164_vm0, %v1130_v30, %v1124_v37  ;;  %v1158_v32 = vsel %vm190_vm2, %v1154_v13, %v1148_v60 }
 0x480   :  { %v1223_v1 = vrot.slane %v1158_v32, 4 }
 0x482   :  { %v1114_v26 = vpop.permute.xlu0 %1113  ;;  %v1112_v16 = vpop.permute.xlu1 %1111 }
 0x483   :  { %v1121_v33 = vsel %vm151_vm1, %v1112_v16, %v1114_v26 }
 0x484   :  { %v1256_v53 = vsel %vm334_vm7, %v1121_v33, %v1212_v5  ;;  %v1211_v5 = vrot.slane %v1134_v6, 4 }
 0x485   :  { %v1272_v28 = vmul.f32 %v1256_v53, %v3114_v48 }
 0x486   :  { %v1138_v0 = vpop.permute.xlu0 %1137  ;;  %v1136_v34 = vpop.permute.xlu1 %1135 }
 0x487   :  { %v1145_v58 = vsel %vm177_vm3, %v1136_v34, %v1138_v0 }
 0x488   :  { %v1260_v19 = vsel %vm334_vm7, %v1145_v58, %v1224_v51 }
 0x489   :  { %v1276_v61 = vmul.f32 %v1260_v19, %v3116_v54 }
 0x48a   :  { %v1128_v18 = vpop.permute.xlu0 %1127  ;;  %v1118_v15 = vpop.permute.xlu1 %1117 }
 0x48b   :  { %v1122_v52 = vsel %vm151_vm1, %v1118_v15, %v1112_v16  ;;  %v2401_v33 = vpack.c.bf16 %v1276_v61, %v1272_v28  ;;  %v1132_v6 = vsel %vm164_vm0, %v1126_v57, %v1128_v18  ;;  %v1131_v32 = vsel %vm164_vm0, %v1128_v18, %v1130_v30 }
 0x48c   :  { %v1255_v51 = vsel %vm334_vm7, %v1122_v52, %v1211_v5  ;;  %v1213_v52 = vrot.slane %v1132_v6, 4 }
 0x48d   :  { %2402 = vmatprep.subr.bf16.mxu0 %v2401_v33  ;;  %v1271_v4 = vmul.f32 %v1255_v51, %v3039_v38  ;;  %v1214_v33 = vrot.slane %v1131_v32, 4 }
 0x48e   :  { %v1152_v58 = vpop.permute.xlu0 %1151  ;;  %v1142_v37 = vpop.permute.xlu1 %1141 }
 0x48f   :  { %v1146_v53 = vsel %vm177_vm3, %v1142_v37, %v1136_v34  ;;  %v1155_v34 = vsel %vm190_vm2, %v1152_v58, %v1154_v13 }
 0x490   :  { %v1259_v19 = vsel %vm334_vm7, %v1146_v53, %v1223_v1  ;;  %v1156_v1 = vsel %vm190_vm2, %v1150_v63, %v1152_v58  ;;  %v1226_v51 = vrot.slane %v1155_v34, 4 }
 0x491   :  { %v1275_v60 = vmul.f32 %v1259_v19, %v3095_v39  ;;  %v1225_v5 = vrot.slane %v1156_v1, 4 }
 0x492   :  { %v1164_v12 = vpop.permute.xlu0 %1163  ;;  %v1162_v10 = vpop.permute.xlu1 %1161 }
 0x493   :  { %v2403_v16 = vpack.c.bf16 %v1275_v60, %v1271_v4  ;;  %v1168_v4 = vsel %vm203_vm8, %v1162_v10, %v1164_v12 }
 0x495   :  { %2404 = vmatpush1.bf16.msra.mxu0 %v2403_v16 }
 0x496   :  { %v1188_v28 = vpop.permute.xlu0 %1187  ;;  %v1186_v61 = vpop.permute.xlu1 %1185 }
 0x49a   :  { %v1140_v53 = vpop.permute.xlu0 %1139  ;;  %v1116_v57 = vpop.permute.xlu1 %1115 }
 0x49b   :  { %v1143_v19 = vsel %vm177_vm3, %v1140_v53, %v1142_v37  ;;  %v1144_v30 = vsel %vm177_vm3, %v1138_v0, %v1140_v53  ;;  %v1119_v13 = vsel %vm151_vm1, %v1116_v57, %v1118_v15  ;;  %v1120_v63 = vsel %vm151_vm1, %v1114_v26, %v1116_v57 }
 0x49c   :  { %v1261_v18 = vsel %vm334_vm7, %v1144_v30, %v1225_v5  ;;  %v1262_v58 = vsel %vm334_vm7, %v1143_v19, %v1226_v51  ;;  %v1257_v60 = vsel %vm334_vm7, %v1120_v63, %v1213_v52  ;;  %v1258_v16 = vsel %vm334_vm7, %v1119_v13, %v1214_v33 }
 0x49d   :  { %v1277_v6 = vmul.f32 %v1261_v18, %v3104_v43  ;;  %v1278_v37 = vmul.f32 %v1262_v58, %v3073_v23  ;;  %v1273_v0 = vmul.f32 %v1257_v60, %v3101_v35  ;;  %v1274_v32 = vmul.f32 %v1258_v16, %v3050_v36 }
 0x49e   :  { %v1236_v15 = vrot.slane %v1168_v4, 4  ;;  %v1184_v34 = vpop.permute.xlu0 %1183  ;;  %v1160_v1 = vpop.permute.xlu1 %1159  ;;  %v1192_v26 = vsel %vm229_vm10, %v1186_v61, %v1188_v28 }
 0x49f   :  { %v2411_v5 = vpack.c.bf16 %v1277_v6, %v1273_v0  ;;  %v1169_v52 = vsel %vm203_vm8, %v1160_v1, %v1162_v10  ;;  %v2409_v51 = vpack.c.bf16 %v1278_v37, %v1274_v32  ;;  %v1248_v53 = vrot.slane %v1192_v26, 4 }
 0x4a0   :  { %v1264_v33 = vsel %vm334_vm7, %v3240_v62, %v1236_v15  ;;  %v1235_v57 = vrot.slane %v1169_v52, 4  ;;  %v1193_v4 = vsel %vm229_vm10, %v1184_v34, %v1186_v61 }
 0x4a1   :  { %2410 = vmatprep.subr.bf16.mxu1 %v2409_v51  ;;  %v1280_v63 = vmul.f32 %v1264_v33, %v3128_v24  ;;  %v1247_v18 = vrot.slane %v1193_v4, 4 }
 0x4a2   :  { %v1176_v19 = vpop.permute.xlu0 %1175  ;;  %2412 = vmatpush1.bf16.msra.mxu1 %v2411_v5  ;;  %v1174_v36 = vpop.permute.xlu1 %1173  ;;  %v1263_v58 = vsel %vm334_vm7, %v3243_v17, %v1235_v57 }
 0x4a3   :  { %v1180_v30 = vsel %vm216_vm9, %v1174_v36, %v1176_v19  ;;  %v1279_v26 = vmul.f32 %v1263_v58, %v3130_v25 }
 0x4a4   :  { %v1268_v13 = vsel %vm334_vm7, %v1180_v30, %v1248_v53 }
 0x4a5   :  { %v1284_v10 = vmul.f32 %v1268_v13, %v3118_v56 }
 0x4a6   :  { %v1172_v60 = vpop.permute.xlu0 %1171  ;;  %v1166_v16 = vpop.permute.xlu1 %1165 }
 0x4a7   :  { %v1181_v6 = vsel %vm216_vm9, %v1172_v60, %v1174_v36  ;;  %v1167_v61 = vsel %vm203_vm8, %v1164_v12, %v1166_v16  ;;  %v1170_v37 = vsel %vm203_vm8, %v1166_v16, %v1160_v1  ;;  %v2405_v0 = vpack.c.bf16 %v1284_v10, %v1280_v63 }
 0x4a8   :  { %v1267_v32 = vsel %vm334_vm7, %v1181_v6, %v1247_v18  ;;  %v1237_v15 = vrot.slane %v1167_v61, 4  ;;  %v1238_v52 = vrot.slane %v1170_v37, 4 }
 0x4a9   :  { %v1283_v5 = vmul.f32 %v1267_v32, %v3132_v27  ;;  %2406 = vmatprep.subr.bf16.mxu0 %v2405_v0 }
 0x4aa   :  { %v1178_v51 = vpop.permute.xlu0 %1177  ;;  %v1190_v33 = vpop.permute.xlu1 %1189  ;;  %v1265_v57 = vsel %vm334_vm7, %v3271_v59, %v1237_v15  ;;  %v1266_v36 = vsel %vm334_vm7, %v3255_v55, %v1238_v52 }
 0x4ab   :  { %v2407_v53 = vpack.c.bf16 %v1283_v5, %v1279_v26  ;;  %v1191_v12 = vsel %vm229_vm10, %v1188_v28, %v1190_v33  ;;  %v1194_v1 = vsel %vm229_vm10, %v1190_v33, %v1184_v34  ;;  %v1179_v13 = vsel %vm216_vm9, %v1176_v19, %v1178_v51 }
 0x4ac   :  { %v1249_v4 = vrot.slane %v1191_v12, 4  ;;  %v1250_v30 = vrot.slane %v1194_v1, 4  ;;  %v1182_v10 = vsel %vm216_vm9, %v1178_v51, %v1172_v60  ;;  %v1281_v58 = vmul.f32 %v1265_v57, %v3149_v50 }
 0x4ad   :  { %2408 = vmatpush1.bf16.msra.mxu0 %v2407_v53  ;;  %v1282_v19 = vmul.f32 %v1266_v36, %v3157_v7  ;;  %v3886_v57 = vmov 0.0  }
 0x4ae   :  { %v1200_v63 = vpop.permute.xlu0 %1199  ;;  %v1198_v18 = vpop.permute.xlu1 %1197  ;;  %v1269_v28 = vsel %vm334_vm7, %v1179_v13, %v1249_v4  ;;  %v1270_v34 = vsel %vm334_vm7, %v1182_v10, %v1250_v30 }
 0x4af   :  { %v1204_v16 = vsel %vm242_vm14, %v1198_v18, %v1200_v63  ;;  %v1285_v6 = vmul.f32 %v1269_v28, %v3155_v14  ;;  %v1286_v37 = vmul.f32 %v1270_v34, %v3159_v31 }
 0x4b0   :  { %v1288_v61 = vmul.f32 %v1204_v16, %v3172_v21 }
 0x4b1   :  { %v2413_v32 = vpack.c.bf16 %v1286_v37, %v1282_v19  ;;  %v2415_v15 = vpack.c.bf16 %v1285_v6, %v1281_v58 }
 0x4b2   :  { %v1202_v60 = vpop.permute.xlu0 %1201  ;;  %2339 = vmatprep.subr.msk.mxu0 %vm334_vm7, %v1288_v61  ;;  %v1196_v0 = vpop.permute.xlu1 %1195 }
 0x4b3   :  { %v1205_v26 = vsel %vm242_vm14, %v1196_v0, %v1198_v18  ;;  %v1206_v5 = vsel %vm242_vm14, %v1202_v60, %v1196_v0  ;;  %v1203_v52 = vsel %vm242_vm14, %v1200_v63, %v1202_v60  ;;  %2414 = vmatprep.subr.bf16.mxu1 %v2413_v32 }
 0x4b4   :  { %v1287_v51 = vmul.f32 %v1205_v26, %v3176_v22  ;;  %v1290_v33 = vmul.f32 %v1206_v5, %v3186_v3  ;;  %2416 = vmatpush1.bf16.msra.mxu1 %v2415_v15  ;;  %v1289_v53 = vmul.f32 %v1203_v52, %v3183_v40 }
 0x4b6   :  { %2340 = vmatpush1.msk.msra.mxu0 %vm334_vm7, %v1287_v51  ;;  %2342 = vmatprep.subr.msk.mxu1 %vm334_vm7, %v1290_v33 }
 0x4b7   :  { %2341 = vmatmul.mubr.msk.f32.vlgmr.msra.gmra.mrb[6].mxu0 %vm889_vm6, %v3191_v44 }
 0x4b8   :  { %1754 = vmatprep.mubr.f32.mxu0 %v3886_v57  ;;  %2343 = vmatpush1.msk.msra.mxu1 %vm334_vm7, %v1289_v53 }
 0x4b9   :  { %2344 = vmatmul.mubr.msk.f32.vlgmr.msra.gmra.mrb[6].mxu1 %vm889_vm6, %v3191_v44 }
 0x4ba   :  { %1825 = vmatprep.mubr.f32.mxu1 %v3886_v57 }
 0x58a   :  { %v1369_v12 = vpop.f32.mrb[6].mxu0 }
 0x58b   :  { %v1370_v1 = vadd.f32 %v1369_v12, %v3209_v41  ;;  %v1371_v36 = vpop.f32.mrb[7].mxu0 }
 0x58c   :  { %v1372_v4 = vadd.f32 %v1371_v36, %v3209_v41  ;;  %v1440_v10 = vpop.f32.mrb[6].mxu1 }
 0x58d   :  { %v1445_v30 = vsel %vm334_vm7, %v1370_v1, 0.0  ;;  %v1455_v13 = vmul.f32 %v1370_v1, %v1370_v1  ;;  %v1441_v58 = vadd.f32 %v1440_v10, %v3209_v41  ;;  %v1442_v28 = vpop.f32.mrb[7].mxu1 }
 0x58e   :  { %v1446_v63 = vsel %vm334_vm7, %v1372_v4, 0.0  ;;  %v1456_v18 = vmul.f32 %v1372_v4, %v1372_v4  ;;  %v1443_v6 = vadd.f32 %v1442_v28, %v3209_v41 }
 0x58f   :  { %v1459_v34 = vsel %vm334_vm7, %v1455_v13, 0.0  ;;  %v1447_v16 = vadd.f32 %v1446_v63, %v1445_v30  ;;  %v1448_v19 = vsel %vm334_vm7, %v1441_v58, 0.0  ;;  %v1457_v37 = vmul.f32 %v1441_v58, %v1441_v58 }
 0x590   :  { %v1460_v61 = vsel %vm334_vm7, %v1456_v18, 0.0  ;;  %v1458_v60 = vmul.f32 %v1443_v6, %v1443_v6  ;;  %v1450_v15 = vsel %vm334_vm7, %v1443_v6, 0.0 }
 0x591   :  { %v1449_v0 = vadd.f32 %v1448_v19, %v1447_v16  ;;  %v1461_v32 = vadd.f32 %v1460_v61, %v1459_v34  ;;  %v1462_v26 = vsel %vm334_vm7, %v1457_v37, 0.0 }
 0x592   :  { %v1464_v51 = vsel %vm334_vm7, %v1458_v60, 0.0 }
 0x593   :  { %v1451_v5 = vadd.f32 %v1450_v15, %v1449_v0  ;;  %v1463_v52 = vadd.f32 %v1462_v26, %v1461_v32 }
 0x595   :  { %1452 = vadd.xlane.f32.xlu1 %v1451_v5  ;;  %v1465_v33 = vadd.f32 %v1464_v51, %v1463_v52 }
 0x597   :  { %1466 = vadd.xlane.f32.xlu0 %v1465_v33 }
 0x622   :  { %v1453_v53 = vpop.xlane.xlu1 %1452 }
 0x623   :  { %v1454_v12 = vmul.f32 0.001953125, %v1453_v53 }
 0x624   :  { %v1467_v36 = vpop.xlane.xlu0 %1466 }
 0x625   :  { %v1468_v30 = vmul.f32 0.001953125, %v1467_v36  ;;  %v1469_v13 = vmul.f32 %v1454_v12, %v1454_v12  ;;  %v1472_v28 = vsub.f32 %v1370_v1, %v1454_v12  ;;  %v1473_v34 = vsub.f32 %v1372_v4, %v1454_v12 }
 0x626   :  { %v1475_v16 = vsub.f32 %v1443_v6, %v1454_v12  ;;  %v1474_v33 = vsub.f32 %v1441_v58, %v1454_v12 }
 0x627   :  { %v1470_v10 = vsub.f32 %v1468_v30, %v1469_v13 }
 0x629   :  { %v1471_v63 = vmax.f32 %v1470_v10, 0.0 }
 0x62b   :  { %v1476_v18 = vadd.f32 1e-05, %v1471_v63 }
 0x62d   :  { %2470 = vrsqrt.f32 %v1476_v18 }
 0x637   :  { %v2471_v61 = vpop.eup %2470 }
 0x638   :  { %v1478_v19 = vmul.f32 %v2471_v61, %v1472_v28  ;;  %v1479_v37 = vmul.f32 %v2471_v61, %v1473_v34  ;;  %v1481_v0 = vmul.f32 %v2471_v61, %v1475_v16  ;;  %v1480_v53 = vmul.f32 %v2471_v61, %v1474_v33 }
 0x63a   :  { %v1482_v60 = vmul.f32 %v1478_v19, %v3229_v20  ;;  %v1483_v32 = vmul.f32 %v1479_v37, %v3229_v20  ;;  %v1485_v15 = vmul.f32 %v1481_v0, %v3229_v20 }
 0x63c   :  { %v1487_v26 = vadd.f32 %v1483_v32, %v3231_v42  ;;  %v1486_v5 = vadd.f32 %v1482_v60, %v3231_v42  ;;  %v1489_v6 = vadd.f32 %v1485_v15, %v3231_v42 }
 0x63e   :  { %v1491_v52 = vmax.f32 %v1487_v26, 0.0  ;;  %v1490_v51 = vmax.f32 %v1486_v5, 0.0  ;;  %v1493_v36 = vmax.f32 %v1489_v6, 0.0 }
 0x640   :  { %v3449_v1 = vadd.f32 %v1491_v52, %v3240_v62  ;;  %v3452_v4 = vadd.f32 %v1490_v51, %v3243_v17  ;;  %v1484_v62 = vmul.f32 %v1480_v53, %v3229_v20  ;;  %v3465_v17 = vadd.f32 %v1493_v36, %v3255_v55 }
 0x642   :  { %1512 = vrot.lane.b32.xlu1 %v3449_v1, %s2586_s2  ;;  %1510 = vrot.lane.b32.xlu0 %v3452_v4, %s2586_s2  ;;  %v1488_v58 = vadd.f32 %v1484_v62, %v3231_v42 }
 0x644   :  { %v1492_v12 = vmax.f32 %v1488_v58, 0.0 }
 0x646   :  { %1534 = vrot.lane.b32.xlu1 %v3452_v4, %s2589_s25  ;;  %1536 = vrot.lane.b32.xlu0 %v3449_v1, %s2589_s25  ;;  %v3481_v55 = vadd.f32 %v1492_v12, %v3271_v59 }
 0x64a   :  { %1516 = vrot.lane.b32.xlu1 %v3465_v17, %s2586_s2  ;;  %1540 = vrot.lane.b32.xlu0 %v3465_v17, %s2589_s25 }
 0x64e   :  { %1498 = vrot.lane.b32.xlu1 %v3452_v4, %s2588_s24  ;;  %1500 = vrot.lane.b32.xlu0 %v3449_v1, %s2588_s24 }
 0x652   :  { %1522 = vrot.lane.b32.xlu1 %v3452_v4, %s2587_s0  ;;  %1524 = vrot.lane.b32.xlu0 %v3449_v1, %s2587_s0 }
 0x656   :  { %1504 = vrot.lane.b32.xlu1 %v3465_v17, %s2588_s24  ;;  %1514 = vrot.lane.b32.xlu0 %v3481_v55, %s2586_s2 }
 0x65a   :  { %1528 = vrot.lane.b32.xlu1 %v3465_v17, %s2587_s0  ;;  %1538 = vrot.lane.b32.xlu0 %v3481_v55, %s2589_s25 }
 0x65e   :  { %1548 = vrot.lane.b32.xlu1 %v3449_v1, %s2590_s26  ;;  %1550 = vrot.lane.b32.xlu0 %v3481_v55, %s2590_s26 }
 0x662   :  { %1572 = vrot.lane.b32.xlu1 %v3449_v1, %s2592_s28  ;;  %1574 = vrot.lane.b32.xlu0 %v3481_v55, %s2592_s28 }
 0x666   :  { %1502 = vrot.lane.b32.xlu1 %v3481_v55, %s2588_s24  ;;  %1526 = vrot.lane.b32.xlu0 %v3481_v55, %s2587_s0 }
 0x66a   :  { %1546 = vrot.lane.b32.xlu1 %v3452_v4, %s2590_s26  ;;  %1570 = vrot.lane.b32.xlu0 %v3452_v4, %s2592_s28 }
 0x66e   :  { %1560 = vrot.lane.b32.xlu1 %v3449_v1, %s2591_s27  ;;  %1562 = vrot.lane.b32.xlu0 %v3481_v55, %s2591_s27 }
 0x672   :  { %1552 = vrot.lane.b32.xlu1 %v3465_v17, %s2590_s26  ;;  %1558 = vrot.lane.b32.xlu0 %v3452_v4, %s2591_s27 }
 0x676   :  { %1576 = vrot.lane.b32.xlu1 %v3465_v17, %s2592_s28  ;;  %1564 = vrot.lane.b32.xlu0 %v3465_v17, %s2591_s27 }
 0x67a   :  { %1584 = vrot.lane.b32.xlu1 %v3449_v1, %s2594_s29  ;;  %1586 = vrot.lane.b32.xlu0 %v3481_v55, %s2594_s29 }
 0x67e   :  { %1582 = vrot.lane.b32.xlu1 %v3452_v4, %s2594_s29  ;;  %1588 = vrot.lane.b32.xlu0 %v3465_v17, %s2594_s29 }
 0x6b4   :  { %v1513_v59 = vpop.permute.xlu1 %1512  ;;  %v1511_v30 = vpop.permute.xlu0 %1510 }
 0x6b5   :  { %v1520_v28 = vsel %vm164_vm0, %v1511_v30, %v1513_v59 }
 0x6b6   :  { %v1599_v37 = vrot.slane %v1520_v28, 4 }
 0x6b8   :  { %v1535_v13 = vpop.permute.xlu1 %1534  ;;  %v1537_v10 = vpop.permute.xlu0 %1536 }
 0x6b9   :  { %v1544_v61 = vsel %vm190_vm2, %v1535_v13, %v1537_v10 }
 0x6ba   :  { %v1611_v0 = vrot.slane %v1544_v61, 4 }
 0x6bc   :  { %v1517_v63 = vpop.permute.xlu1 %1516  ;;  %v1541_v18 = vpop.permute.xlu0 %1540 }
 0x6bd   :  { %v1521_v52 = vsel %vm164_vm0, %v1517_v63, %v1511_v30  ;;  %v1545_v36 = vsel %vm190_vm2, %v1541_v18, %v1535_v13 }
 0x6be   :  { %v1598_v12 = vrot.slane %v1521_v52, 4  ;;  %v1610_v28 = vrot.slane %v1545_v36, 4 }
 0x6c0   :  { %v1499_v34 = vpop.permute.xlu1 %1498  ;;  %v1501_v16 = vpop.permute.xlu0 %1500 }
 0x6c1   :  { %v1508_v19 = vsel %vm151_vm1, %v1499_v34, %v1501_v16 }
 0x6c2   :  { %v1643_v60 = vsel %vm334_vm7, %v1508_v19, %v1599_v37 }
 0x6c3   :  { %v1659_v51 = vmul.f32 %v1643_v60, %v3114_v48 }
 0x6c4   :  { %v1523_v32 = vpop.permute.xlu1 %1522  ;;  %v1525_v15 = vpop.permute.xlu0 %1524 }
 0x6c5   :  { %v1532_v26 = vsel %vm177_vm3, %v1523_v32, %v1525_v15 }
 0x6c6   :  { %v1647_v5 = vsel %vm334_vm7, %v1532_v26, %v1611_v0 }
 0x6c7   :  { %v1663_v6 = vmul.f32 %v1647_v5, %v3116_v54 }
 0x6c8   :  { %v1505_v33 = vpop.permute.xlu1 %1504  ;;  %v1515_v53 = vpop.permute.xlu0 %1514 }
 0x6c9   :  { %v1509_v62 = vsel %vm151_vm1, %v1505_v33, %v1499_v34  ;;  %v2417_v58 = vpack.c.bf16 %v1663_v6, %v1659_v51  ;;  %v1519_v26 = vsel %vm164_vm0, %v1513_v59, %v1515_v53  ;;  %v1518_v51 = vsel %vm164_vm0, %v1515_v53, %v1517_v63 }
 0x6ca   :  { %v1642_v61 = vsel %vm334_vm7, %v1509_v62, %v1598_v12  ;;  %v1600_v6 = vrot.slane %v1519_v26, 4 }
 0x6cb   :  { %2418 = vmatprep.subr.bf16.mxu0 %v2417_v58  ;;  %v1658_v37 = vmul.f32 %v1642_v61, %v3039_v38 }
 0x6cc   :  { %v1529_v19 = vpop.permute.xlu1 %1528  ;;  %v1539_v30 = vpop.permute.xlu0 %1538 }
 0x6cd   :  { %v1533_v48 = vsel %vm177_vm3, %v1529_v19, %v1523_v32  ;;  %v1542_v32 = vsel %vm190_vm2, %v1539_v30, %v1541_v18  ;;  %v1543_v38 = vsel %vm190_vm2, %v1537_v10, %v1539_v30 }
 0x6ce   :  { %v1646_v54 = vsel %vm334_vm7, %v1533_v48, %v1610_v28  ;;  %v1612_v36 = vrot.slane %v1543_v38, 4  ;;  %v1613_v62 = vrot.slane %v1542_v32, 4 }
 0x6cf   :  { %v1662_v13 = vmul.f32 %v1646_v54, %v3095_v39  ;;  %v1601_v39 = vrot.slane %v1518_v51, 4 }
 0x6d0   :  { %v1549_v0 = vpop.permute.xlu1 %1548  ;;  %v1551_v60 = vpop.permute.xlu0 %1550 }
 0x6d1   :  { %v2419_v34 = vpack.c.bf16 %v1662_v13, %v1658_v37  ;;  %v1555_v58 = vsel %vm203_vm8, %v1549_v0, %v1551_v60 }
 0x6d2   :  { %v1623_v13 = vrot.slane %v1555_v58, 4 }
 0x6d3   :  { %2420 = vmatpush1.bf16.msra.mxu0 %v2419_v34 }
 0x6d4   :  { %v1573_v5 = vpop.permute.xlu1 %1572  ;;  %v1575_v52 = vpop.permute.xlu0 %1574 }
 0x6d5   :  { %v1579_v26 = vsel %vm229_vm10, %v1573_v5, %v1575_v52 }
 0x6d8   :  { %v1503_v12 = vpop.permute.xlu1 %1502  ;;  %v1527_v59 = vpop.permute.xlu0 %1526 }
 0x6d9   :  { %v1506_v28 = vsel %vm151_vm1, %v1503_v12, %v1505_v33  ;;  %v1507_v63 = vsel %vm151_vm1, %v1501_v16, %v1503_v12  ;;  %v1530_v18 = vsel %vm177_vm3, %v1527_v59, %v1529_v19  ;;  %v1531_v10 = vsel %vm177_vm3, %v1525_v15, %v1527_v59  ;;  %v3574_v33 = vld [vmem:[#allocation8 + $0x18] sm:$0xff] }
 0x6da   :  { %v1644_v53 = vsel %vm334_vm7, %v1507_v63, %v1600_v6  ;;  %v1645_v61 = vsel %vm334_vm7, %v1506_v28, %v1601_v39  ;;  %v1648_v30 = vsel %vm334_vm7, %v1531_v10, %v1612_v36  ;;  %v1649_v48 = vsel %vm334_vm7, %v1530_v18, %v1613_v62 }
 0x6db   :  { %v1660_v54 = vmul.f32 %v1644_v53, %v3101_v35  ;;  %v1661_v16 = vmul.f32 %v3574_v33, %v1645_v61  ;;  %v1664_v37 = vmul.f32 %v1648_v30, %v3104_v43  ;;  %v1665_v19 = vmul.f32 %v1649_v48, %v3073_v23 }
 0x6dc   :  { %v1547_v15 = vpop.permute.xlu1 %1546  ;;  %v1571_v34 = vpop.permute.xlu0 %1570  ;;  %v1651_v35 = vsel %vm334_vm7, %v3449_v1, %v1623_v13  ;;  %v1635_v6 = vrot.slane %v1579_v26, 4 }
 0x6dd   :  { %v2427_v51 = vpack.c.bf16 %v1664_v37, %v1660_v54  ;;  %v1556_v32 = vsel %vm203_vm8, %v1547_v15, %v1549_v0  ;;  %v2425_v38 = vpack.c.bf16 %v1665_v19, %v1661_v16  ;;  %v1580_v36 = vsel %vm229_vm10, %v1571_v34, %v1573_v5 }
 0x6de   :  { %v1622_v39 = vrot.slane %v1556_v32, 4  ;;  %v1667_v12 = vmul.f32 %v1651_v35, %v3128_v24  ;;  %v1634_v28 = vrot.slane %v1580_v36, 4 }
 0x6df   :  { %2426 = vmatprep.subr.bf16.mxu1 %v2425_v38 }
 0x6e0   :  { %v1561_v43 = vpop.permute.xlu1 %1560  ;;  %2428 = vmatpush1.bf16.msra.mxu1 %v2427_v51  ;;  %v1563_v23 = vpop.permute.xlu0 %1562  ;;  %v1650_v59 = vsel %vm334_vm7, %v3452_v4, %v1622_v39 }
 0x6e1   :  { %v1567_v62 = vsel %vm216_vm9, %v1561_v43, %v1563_v23  ;;  %v1666_v48 = vmul.f32 %v1650_v59, %v3130_v25 }
 0x6e2   :  { %v1655_v58 = vsel %vm334_vm7, %v1567_v62, %v1635_v6 }
 0x6e3   :  { %v1671_v0 = vmul.f32 %v1655_v58, %v3118_v56 }
 0x6e4   :  { %v1553_v63 = vpop.permute.xlu1 %1552  ;;  %v1559_v18 = vpop.permute.xlu0 %1558 }
 0x6e5   :  { %v1554_v10 = vsel %vm203_vm8, %v1551_v60, %v1553_v63  ;;  %v1557_v5 = vsel %vm203_vm8, %v1553_v63, %v1547_v15  ;;  %v1568_v53 = vsel %vm216_vm9, %v1559_v18, %v1561_v43  ;;  %v2421_v61 = vpack.c.bf16 %v1671_v0, %v1667_v12 }
 0x6e6   :  { %v1624_v30 = vrot.slane %v1554_v10, 4  ;;  %v1625_v56 = vrot.slane %v1557_v5, 4  ;;  %v1654_v24 = vsel %vm334_vm7, %v1568_v53, %v1634_v28 }
 0x6e7   :  { %v1670_v54 = vmul.f32 %v1654_v24, %v3132_v27  ;;  %2422 = vmatprep.subr.bf16.mxu0 %v2421_v61 }
 0x6e8   :  { %v1577_v16 = vpop.permute.xlu1 %1576  ;;  %v1565_v37 = vpop.permute.xlu0 %1564  ;;  %v1652_v60 = vsel %vm334_vm7, %v3481_v55, %v1624_v30  ;;  %v1653_v26 = vsel %vm334_vm7, %v3465_v17, %v1625_v56 }
 0x6e9   :  { %v2423_v19 = vpack.c.bf16 %v1670_v54, %v1666_v48  ;;  %v1578_v13 = vsel %vm229_vm10, %v1575_v52, %v1577_v16  ;;  %v1581_v15 = vsel %vm229_vm10, %v1577_v16, %v1571_v34  ;;  %v1566_v27 = vsel %vm216_vm9, %v1563_v23, %v1565_v37 }
 0x6ea   :  { %v1636_v51 = vrot.slane %v1578_v13, 4  ;;  %v1637_v25 = vrot.slane %v1581_v15, 4  ;;  %v1569_v32 = vsel %vm216_vm9, %v1565_v37, %v1559_v18  ;;  %v1668_v38 = vmul.f32 %v1652_v60, %v3149_v50 }
 0x6eb   :  { %2424 = vmatpush1.bf16.msra.mxu0 %v2423_v19  ;;  %v1669_v23 = vmul.f32 %v1653_v26, %v3157_v7 }
 0x6ec   :  { %v1656_v35 = vsel %vm334_vm7, %v1566_v27, %v1636_v51  ;;  %v1657_v52 = vsel %vm334_vm7, %v1569_v32, %v1637_v25  ;;  %v1585_v6 = vpop.permute.xlu1 %1584  ;;  %v1587_v34 = vpop.permute.xlu0 %1586 }
 0x6ed   :  { %v1672_v39 = vmul.f32 %v1656_v35, %v3155_v14  ;;  %v1673_v43 = vmul.f32 %v1657_v52, %v3159_v31  ;;  %v1591_v36 = vsel %vm242_vm14, %v1585_v6, %v1587_v34 }
 0x6ee   :  { %v1675_v62 = vmul.f32 %v1591_v36, %v3172_v21 }
 0x6ef   :  { %v2431_v58 = vpack.c.bf16 %v1672_v39, %v1668_v38  ;;  %v2429_v0 = vpack.c.bf16 %v1673_v43, %v1669_v23 }
 0x6f0   :  { %v1583_v50 = vpop.permute.xlu1 %1582  ;;  %2345 = vmatprep.subr.msk.mxu0 %vm334_vm7, %v1675_v62  ;;  %v1589_v12 = vpop.permute.xlu0 %1588 }
 0x6f1   :  { %v1592_v59 = vsel %vm242_vm14, %v1583_v50, %v1585_v6  ;;  %v1590_v14 = vsel %vm242_vm14, %v1587_v34, %v1589_v12  ;;  %v1593_v31 = vsel %vm242_vm14, %v1589_v12, %v1583_v50  ;;  %2430 = vmatprep.subr.bf16.mxu1 %v2429_v0 }
 0x6f2   :  { %v1674_v7 = vmul.f32 %v1592_v59, %v3176_v22  ;;  %v1677_v21 = vmul.f32 %v1593_v31, %v3186_v3  ;;  %2432 = vmatpush1.bf16.msra.mxu1 %v2431_v58  ;;  %v1676_v28 = vmul.f32 %v1590_v14, %v3183_v40 }
 0x6f4   :  { %2346 = vmatpush1.msk.msra.mxu0 %vm334_vm7, %v1674_v7  ;;  %2348 = vmatprep.subr.msk.mxu1 %vm334_vm7, %v1677_v21 }
 0x6f5   :  { %2347 = vmatmul.mubr.msk.f32.vlgmr.msra.gmra.mrb[8].mxu0 %vm889_vm6, %v3191_v44 }
 0x6f6   :  { %2349 = vmatpush1.msk.msra.mxu1 %vm334_vm7, %v1676_v28  ;;  %2153 = vmatprep.mubr.f32.mxu0 %v3886_v57 }
 0x6f7   :  { %2350 = vmatmul.mubr.msk.f32.vlgmr.msra.gmra.mrb[8].mxu1 %vm889_vm6, %v3191_v44 }
 0x6f8   :  { %2224 = vmatprep.mubr.f32.mxu1 %v3886_v57 }
 0x7c8   :  { %v1756_v22 = vpop.f32.mrb[8].mxu0 }
 0x7c9   :  { %v1757_v3 = vadd.f32 %v1756_v22, %v3209_v41  ;;  %v1758_v40 = vpop.f32.mrb[9].mxu0 }
 0x7ca   :  { %v1759_v63 = vadd.f32 %v1758_v40, %v3209_v41  ;;  %v1827_v18 = vpop.f32.mrb[8].mxu1 }
 0x7cb   :  { %v1832_v10 = vsel %vm334_vm7, %v1757_v3, 0.0  ;;  %v1842_v5 = vmul.f32 %v1757_v3, %v1757_v3  ;;  %v1828_v53 = vadd.f32 %v1827_v18, %v3209_v41  ;;  %v1829_v61 = vpop.f32.mrb[9].mxu1 }
 0x7cc   :  { %v1833_v30 = vsel %vm334_vm7, %v1759_v63, 0.0  ;;  %v1843_v56 = vmul.f32 %v1759_v63, %v1759_v63  ;;  %v1830_v44 = vadd.f32 %v1829_v61, %v3209_v41 }
 0x7cd   :  { %v1846_v57 = vsel %vm334_vm7, %v1842_v5, 0.0  ;;  %v1834_v24 = vadd.f32 %v1833_v30, %v1832_v10  ;;  %v1835_v48 = vsel %vm334_vm7, %v1828_v53, 0.0  ;;  %v1844_v54 = vmul.f32 %v1828_v53, %v1828_v53 }
 0x7ce   :  { %v1847_v16 = vsel %vm334_vm7, %v1843_v56, 0.0  ;;  %v1845_v37 = vmul.f32 %v1830_v44, %v1830_v44  ;;  %v1837_v15 = vsel %vm334_vm7, %v1830_v44, 0.0 }
 0x7cf   :  { %v1836_v60 = vadd.f32 %v1835_v48, %v1834_v24  ;;  %v1848_v19 = vadd.f32 %v1847_v16, %v1846_v57  ;;  %v1849_v13 = vsel %vm334_vm7, %v1844_v54, 0.0 }
 0x7d0   :  { %v1851_v25 = vsel %vm334_vm7, %v1845_v37, 0.0 }
 0x7d1   :  { %v1838_v26 = vadd.f32 %v1837_v15, %v1836_v60  ;;  %v1850_v51 = vadd.f32 %v1849_v13, %v1848_v19 }
 0x7d3   :  { %1839 = vadd.xlane.f32.xlu1 %v1838_v26  ;;  %v1852_v41 = vadd.f32 %v1851_v25, %v1850_v51 }
 0x7d5   :  { %1853 = vadd.xlane.f32.xlu0 %v1852_v41 }
 0x860   :  { %v1840_v27 = vpop.xlane.xlu1 %1839 }
 0x861   :  { %v1841_v32 = vmul.f32 0.001953125, %v1840_v27 }
 0x862   :  { %v1854_v38 = vpop.xlane.xlu0 %1853 }
 0x863   :  { %v1855_v35 = vmul.f32 0.001953125, %v1854_v38  ;;  %v1856_v52 = vmul.f32 %v1841_v32, %v1841_v32  ;;  %v1859_v43 = vsub.f32 %v1757_v3, %v1841_v32  ;;  %v1860_v36 = vsub.f32 %v1759_v63, %v1841_v32 }
 0x864   :  { %v1861_v23 = vsub.f32 %v1828_v53, %v1841_v32  ;;  %v1862_v62 = vsub.f32 %v1830_v44, %v1841_v32 }
 0x865   :  { %v1857_v6 = vsub.f32 %v1855_v35, %v1856_v52 }
 0x867   :  { %v1858_v34 = vmax.f32 %v1857_v6, 0.0 }
 0x869   :  { %v1863_v39 = vadd.f32 1e-05, %v1858_v34 }
 0x86b   :  { %2472 = vrsqrt.f32 %v1863_v39 }
 0x875   :  { %v2473_v58 = vpop.eup %2472 }
 0x876   :  { %v1866_v0 = vmul.f32 %v2473_v58, %v1860_v36  ;;  %v1865_v50 = vmul.f32 %v2473_v58, %v1859_v43  ;;  %v1867_v12 = vmul.f32 %v2473_v58, %v1861_v23  ;;  %v1868_v59 = vmul.f32 %v2473_v58, %v1862_v62 }
 0x878   :  { %v1870_v14 = vmul.f32 %v1866_v0, %v3229_v20  ;;  %v1869_v31 = vmul.f32 %v1865_v50, %v3229_v20  ;;  %v1871_v7 = vmul.f32 %v1867_v12, %v3229_v20  ;;  %v1872_v21 = vmul.f32 %v1868_v59, %v3229_v20  ;;  %v2491_v59 = vld [vmem:[#allocation8 + $0x8] sm:$0xff] }
 0x87a   :  { %v1874_v28 = vadd.f32 %v1870_v14, %v3231_v42  ;;  %v1873_v22 = vadd.f32 %v1869_v31, %v3231_v42  ;;  %v1875_v3 = vadd.f32 %v1871_v7, %v3231_v42  ;;  %v1876_v40 = vadd.f32 %v1872_v21, %v3231_v42  ;;  %v2492_v7 = vld [vmem:[#allocation8 + $0x28] sm:$0xff] }
 0x87c   :  { %v1878_v63 = vmax.f32 %v1874_v28, 0.0  ;;  %v1877_v18 = vmax.f32 %v1873_v22, 0.0  ;;  %v1879_v53 = vmax.f32 %v1875_v3, 0.0  ;;  %v1880_v61 = vmax.f32 %v1876_v40, 0.0  ;;  %v2493_v3 = vld [vmem:[#allocation8 + $0x10] sm:$0xff] }
 0x87e   :  { %v3664_v10 = vadd.f32 %v1878_v63, %v3449_v1  ;;  %v3667_v5 = vadd.f32 %v1877_v18, %v3452_v4  ;;  %v3674_v20 = vadd.f32 %v1879_v53, %v3481_v55  ;;  %v3677_v42 = vadd.f32 %v1880_v61, %v3465_v17  ;;  %v116_v1 = vld [vmem:[#allocation2] sm:$0x1] }
 0x880   :  { %1899 = vrot.lane.b32.xlu1 %v3664_v10, %s2586_s2  ;;  %1897 = vrot.lane.b32.xlu0 %v3667_v5, %s2586_s2 }
 0x884   :  { %1901 = vrot.lane.b32.xlu1 %v3674_v20, %s2586_s2  ;;  %1903 = vrot.lane.b32.xlu0 %v3677_v42, %s2586_s2 }
 0x888   :  { %1921 = vrot.lane.b32.xlu1 %v3667_v5, %s2589_s25  ;;  %1923 = vrot.lane.b32.xlu0 %v3664_v10, %s2589_s25 }
 0x88c   :  { %1925 = vrot.lane.b32.xlu1 %v3674_v20, %s2589_s25  ;;  %1927 = vrot.lane.b32.xlu0 %v3677_v42, %s2589_s25 }
 0x890   :  { %1885 = vrot.lane.b32.xlu1 %v3667_v5, %s2588_s24  ;;  %1887 = vrot.lane.b32.xlu0 %v3664_v10, %s2588_s24 }
 0x894   :  { %1889 = vrot.lane.b32.xlu1 %v3674_v20, %s2588_s24  ;;  %1891 = vrot.lane.b32.xlu0 %v3677_v42, %s2588_s24 }
 0x898   :  { %1909 = vrot.lane.b32.xlu1 %v3667_v5, %s2587_s0  ;;  %1911 = vrot.lane.b32.xlu0 %v3664_v10, %s2587_s0 }
 0x89c   :  { %1913 = vrot.lane.b32.xlu1 %v3674_v20, %s2587_s0  ;;  %1915 = vrot.lane.b32.xlu0 %v3677_v42, %s2587_s0 }
 0x8a0   :  { %1933 = vrot.lane.b32.xlu1 %v3667_v5, %s2590_s26  ;;  %1935 = vrot.lane.b32.xlu0 %v3664_v10, %s2590_s26 }
 0x8a4   :  { %1937 = vrot.lane.b32.xlu1 %v3674_v20, %s2590_s26  ;;  %1939 = vrot.lane.b32.xlu0 %v3677_v42, %s2590_s26 }
 0x8a8   :  { %1957 = vrot.lane.b32.xlu1 %v3667_v5, %s2592_s28  ;;  %1959 = vrot.lane.b32.xlu0 %v3664_v10, %s2592_s28 }
 0x8ac   :  { %1961 = vrot.lane.b32.xlu1 %v3674_v20, %s2592_s28  ;;  %1963 = vrot.lane.b32.xlu0 %v3677_v42, %s2592_s28 }
 0x8b0   :  { %1945 = vrot.lane.b32.xlu1 %v3667_v5, %s2591_s27  ;;  %1947 = vrot.lane.b32.xlu0 %v3664_v10, %s2591_s27 }
 0x8b4   :  { %1949 = vrot.lane.b32.xlu1 %v3674_v20, %s2591_s27  ;;  %1951 = vrot.lane.b32.xlu0 %v3677_v42, %s2591_s27 }
 0x8b8   :  { %1969 = vrot.lane.b32.xlu1 %v3667_v5, %s2594_s29  ;;  %1971 = vrot.lane.b32.xlu0 %v3664_v10, %s2594_s29 }
 0x8bc   :  { %1973 = vrot.lane.b32.xlu1 %v3674_v20, %s2594_s29  ;;  %1975 = vrot.lane.b32.xlu0 %v3677_v42, %s2594_s29 }
 0x8c0   :  { %2067 = vperm.xlu1 %2467, %v116_v1  }
 0x8f2   :  { %v1900_v4 = vpop.permute.xlu1 %1899  ;;  %v1898_v17 = vpop.permute.xlu0 %1897 }
 0x8f3   :  { %v1907_v16 = vsel %vm164_vm0, %v1898_v17, %v1900_v4 }
 0x8f4   :  { %v1986_v51 = vrot.slane %v1907_v16, 4  ;;  %v2496_v16 = vld [vmem:[#allocation8 + $0x20] sm:$0xff] }
 0x8f6   :  { %v1902_v55 = vpop.permute.xlu1 %1901  ;;  %v1904_v30 = vpop.permute.xlu0 %1903 }
 0x8f7   :  { %v1906_v37 = vsel %vm164_vm0, %v1900_v4, %v1902_v55  ;;  %v1908_v60 = vsel %vm164_vm0, %v1904_v30, %v1898_v17  ;;  %v1905_v27 = vsel %vm164_vm0, %v1902_v55, %v1904_v30  ;;  %v2494_v55 = vld [vmem:[#allocation8] sm:$0xff] }
 0x8f8   :  { %v1987_v41 = vrot.slane %v1906_v37, 4  ;;  %v1985_v32 = vrot.slane %v1908_v60, 4  ;;  %v1988_v0 = vrot.slane %v1905_v27, 4  ;;  %v2497_v60 = vld [vmem:[#allocation8 + $0x38] sm:$0xff] }
 0x8fa   :  { %v1922_v56 = vpop.permute.xlu1 %1921  ;;  %v1924_v44 = vpop.permute.xlu0 %1923 }
 0x8fb   :  { %v1931_v19 = vsel %vm190_vm2, %v1922_v56, %v1924_v44 }
 0x8fc   :  { %v1998_v38 = vrot.slane %v1931_v19, 4 }
 0x8fe   :  { %v1926_v57 = vpop.permute.xlu1 %1925  ;;  %v1928_v24 = vpop.permute.xlu0 %1927 }
 0x8ff   :  { %v1930_v35 = vsel %vm190_vm2, %v1924_v44, %v1926_v57  ;;  %v1929_v52 = vsel %vm190_vm2, %v1926_v57, %v1928_v24  ;;  %v1932_v36 = vsel %vm190_vm2, %v1928_v24, %v1922_v56 }
 0x900   :  { %v1999_v12 = vrot.slane %v1930_v35, 4  ;;  %v1997_v28 = vrot.slane %v1932_v36, 4  ;;  %v2000_v22 = vrot.slane %v1929_v52, 4 }
 0x902   :  { %v1886_v48 = vpop.permute.xlu1 %1885  ;;  %v1888_v54 = vpop.permute.xlu0 %1887 }
 0x903   :  { %v1895_v26 = vsel %vm151_vm1, %v1886_v48, %v1888_v54 }
 0x904   :  { %v2030_v6 = vsel %vm334_vm7, %v1895_v26, %v1986_v51 }
 0x905   :  { %v2046_v14 = vmul.f32 %v2491_v59, %v2030_v6 }
 0x906   :  { %v1890_v13 = vpop.permute.xlu1 %1889  ;;  %v1892_v15 = vpop.permute.xlu0 %1891 }
 0x907   :  { %v1894_v25 = vsel %vm151_vm1, %v1888_v54, %v1890_v13  ;;  %v1896_v34 = vsel %vm151_vm1, %v1892_v15, %v1886_v48  ;;  %v1893_v62 = vsel %vm151_vm1, %v1890_v13, %v1892_v15  ;;  %v2495_v48 = vld [vmem:[#allocation8 + $0x30] sm:$0xff] }
 0x908   :  { %v2031_v23 = vsel %vm334_vm7, %v1894_v25, %v1987_v41  ;;  %v2029_v31 = vsel %vm334_vm7, %v1896_v34, %v1985_v32  ;;  %v2032_v63 = vsel %vm334_vm7, %v1893_v62, %v1988_v0 }
 0x909   :  { %v2047_v40 = vmul.f32 %v2493_v3, %v2031_v23  ;;  %v2045_v30 = vmul.f32 %v2494_v55, %v2029_v31  ;;  %v2048_v24 = vmul.f32 %v3574_v33, %v2032_v63  ;;  %v2499_v55 = vld [vmem:[#allocation8 + $0x48] sm:$0xff] }
 0x90a   :  { %v1910_v39 = vpop.permute.xlu1 %1909  ;;  %v1912_v43 = vpop.permute.xlu0 %1911 }
 0x90b   :  { %v1919_v58 = vsel %vm177_vm3, %v1910_v39, %v1912_v43 }
 0x90c   :  { %v2034_v50 = vsel %vm334_vm7, %v1919_v58, %v1998_v38 }
 0x90d   :  { %v2050_v21 = vmul.f32 %v2492_v7, %v2034_v50 }
 0x90e   :  { %v1914_v18 = vpop.permute.xlu1 %1913  ;;  %v1916_v53 = vpop.permute.xlu0 %1915 }
 0x90f   :  { %v1918_v61 = vsel %vm177_vm3, %v1912_v43, %v1914_v18  ;;  %v1917_v1 = vsel %vm177_vm3, %v1914_v18, %v1916_v53  ;;  %v1920_v4 = vsel %vm177_vm3, %v1916_v53, %v1910_v39  ;;  %v2433_v17 = vpack.c.bf16 %v2050_v21, %v2046_v14 }
 0x910   :  { %v2035_v56 = vsel %vm334_vm7, %v1918_v61, %v1999_v12  ;;  %v2033_v44 = vsel %vm334_vm7, %v1920_v4, %v1997_v28  ;;  %v2036_v57 = vsel %vm334_vm7, %v1917_v1, %v2000_v22 }
 0x911   :  { %v2051_v54 = vmul.f32 %v2495_v48, %v2035_v56  ;;  %v2049_v37 = vmul.f32 %v2496_v16, %v2033_v44  ;;  %v2052_v19 = vmul.f32 %v2497_v60, %v2036_v57  ;;  %2434 = vmatprep.subr.bf16.mxu0 %v2433_v17  ;;  %v2501_v48 = vld [vmem:[#allocation8 + $0x68] sm:$0xff]  ;;  %v2502_v16 = vld [vmem:[#allocation8 + $0x70] sm:$0xff]  ;;  %v2503_v60 = vld [vmem:[#allocation8 + $0x78] sm:$0xff] }
 0x912   :  { %v1934_v13 = vpop.permute.xlu1 %1933  ;;  %v1936_v15 = vpop.permute.xlu0 %1935 }
 0x913   :  { %v2443_v26 = vpack.c.bf16 %v2051_v54, %v2047_v40  ;;  %v2435_v51 = vpack.c.bf16 %v2049_v37, %v2045_v30  ;;  %v2441_v25 = vpack.c.bf16 %v2052_v19, %v2048_v24  ;;  %v1943_v52 = vsel %vm203_vm8, %v1934_v13, %v1936_v15  ;;  %v2498_v40 = vld [vmem:[#allocation8 + $0x50] sm:$0xff]  ;;  %v2500_v30 = vld [vmem:[#allocation8 + $0x60] sm:$0xff] }
 0x914   :  { %v2009_v62 = vrot.slane %v1943_v52, 4 }
 0x915   :  { %2436 = vmatpush1.bf16.msra.mxu0 %v2435_v51  ;;  %2442 = vmatprep.subr.bf16.mxu1 %v2441_v25 }
 0x916   :  { %v1938_v41 = vpop.permute.xlu1 %1937  ;;  %2444 = vmatpush1.bf16.msra.mxu1 %v2443_v26  ;;  %v1940_v27 = vpop.permute.xlu0 %1939  ;;  %v2505_v26 = vld [vmem:[#allocation8 + $0x40] sm:$0xff] }
 0x917   :  { %v1941_v33 = vsel %vm203_vm8, %v1938_v41, %v1940_v27  ;;  %v1942_v35 = vsel %vm203_vm8, %v1936_v15, %v1938_v41  ;;  %v1944_v6 = vsel %vm203_vm8, %v1940_v27, %v1934_v13  ;;  %v2504_v13 = vld [vmem:[#allocation8 + $0x58] sm:$0xff] }
 0x918   :  { %v2011_v34 = vrot.slane %v1941_v33, 4  ;;  %v2010_v23 = vrot.slane %v1942_v35, 4  ;;  %v2012_v58 = vrot.slane %v1944_v6, 4 }
 0x91a   :  { %v1958_v32 = vpop.permute.xlu1 %1957  ;;  %v1960_v38 = vpop.permute.xlu0 %1959  ;;  %v2039_v0 = vsel %vm334_vm7, %v3674_v20, %v2011_v34  ;;  %v2038_v28 = vsel %vm334_vm7, %v3664_v10, %v2010_v23  ;;  %v2037_v20 = vsel %vm334_vm7, %v3667_v5, %v2009_v62  ;;  %v2040_v22 = vsel %vm334_vm7, %v3677_v42, %v2012_v58  ;;  %v2507_v62 = vld [vmem:[#allocation8 + $0x90] sm:$0xf] }
 0x91b   :  { %v1967_v36 = vsel %vm229_vm10, %v1958_v32, %v1960_v38  ;;  %v2055_v63 = vmul.f32 %v2498_v40, %v2039_v0  ;;  %v2054_v42 = vmul.f32 %v2499_v55, %v2038_v28  ;;  %v2056_v15 = vmul.f32 %v2504_v13, %v2040_v22  ;;  %v2508_v0 = vld [vmem:[#allocation8 + $0x98] sm:$0xf] }
 0x91c   :  { %v2021_v50 = vrot.slane %v1967_v36, 4  ;;  %v2053_v51 = vmul.f32 %v2505_v26, %v2037_v20  ;;  %v2506_v36 = vld [vmem:[#allocation8 + $0x88] sm:$0xf]  ;;  %v521_v55 = vand.u32 2147483647, %v2938_v46  ;;  %v540_v46 = vstv %s3875_s12  ;;  %s2598_s12 = smov [#allocation10]  }
 0x91d   :  { %v545_v26 = vstv %s3876_s13  ;;  %s2311_s13 = sshll.u32 %s2598_s12, 4  ;;  %s2312_s13 = int_to_ptr.vmem [resolvable:$true] %s2311_s13 }
 0x91e   :  { %v1962_v39 = vpop.permute.xlu1 %1961  ;;  %v1964_v43 = vpop.permute.xlu0 %1963  ;;  %s2554_s2 = scalar_lea.vmem %s2312_s13, 64  ;;  %p2559_p3 = scmp.lt.s32.totalorder %s2312_s13, %s2312_s13 }
 0x91f   :  { %v1966_v14 = vsel %vm229_vm10, %v1960_v38, %v1962_v39  ;;  %v1965_v31 = vsel %vm229_vm10, %v1962_v39, %v1964_v43  ;;  %v1968_v7 = vsel %vm229_vm10, %v1964_v43, %v1958_v32  ;;  %p2555_p2 = scmp.ne.s32.totalorder %s2312_s13, %s2554_s2  ;;  %p2560_p4 = scmp.lt.s32.totalorder %s2554_s2, %s2554_s2 }
 0x920   :  { %v2022_v18 = vrot.slane %v1966_v14, 4  ;;  %v2023_v53 = vrot.slane %v1965_v31, 4  ;;  %v2024_v61 = vrot.slane %v1968_v7, 4  ;;  %v115_v14 = vld [vmem:[%s3872_s9] sm:$0x1]  ;;  %v3887_v31 = vsub.s32 0, %v2702_v2 }
 0x921   :  { %p2561_p5 = por %p2560_p4, %p2559_p3 }
 0x922   :  { %v1946_v12 = vpop.permute.xlu1 %1945  ;;  %v1948_v59 = vpop.permute.xlu0 %1947 }
 0x923   :  { %v1955_v21 = vsel %vm216_vm9, %v1946_v12, %v1948_v59  ;;  %p2562_p6 = pnand %p2561_p5, %p2555_p2 }
 0x924   :  { %v2041_v3 = vsel %vm334_vm7, %v1955_v21, %v2021_v50 }
 0x925   :  { %v2057_v56 = vmul.f32 %v2500_v30, %v2041_v3  ;;  %v523_v30 = vand.u32 2147483647, %v2942_v49 }
 0x926   :  { %v1950_v1 = vpop.permute.xlu1 %1949  ;;  %v1952_v4 = vpop.permute.xlu0 %1951 }
 0x927   :  { %v1954_v17 = vsel %vm216_vm9, %v1948_v59, %v1950_v1  ;;  %v1953_v10 = vsel %vm216_vm9, %v1950_v1, %v1952_v4  ;;  %v1956_v5 = vsel %vm216_vm9, %v1952_v4, %v1946_v12  ;;  %v2439_v33 = vpack.c.bf16 %v2057_v56, %v2053_v51  ;;  %v2509_v12 = vld [vmem:[#allocation8 + $0x80] sm:$0xf] }
 0x928   :  { %v2042_v44 = vsel %vm334_vm7, %v1954_v17, %v2022_v18  ;;  %v2043_v57 = vsel %vm334_vm7, %v1953_v10, %v2023_v53  ;;  %v2044_v24 = vsel %vm334_vm7, %v1956_v5, %v2024_v61  ;;  %v520_v17 = vand.u32 2147483647, %v2936_v45 }
 0x929   :  { %v2058_v54 = vmul.f32 %v2501_v48, %v2042_v44  ;;  %v2059_v37 = vmul.f32 %v2502_v16, %v2043_v57  ;;  %v2060_v19 = vmul.f32 %v2503_v60, %v2044_v24  ;;  %v522_v10 = vand.u32 2147483647, %v2940_v47 }
 0x92a   :  { %v1970_v25 = vpop.permute.xlu1 %1969  ;;  %v1972_v41 = vpop.permute.xlu0 %1971  ;;  %v528_v57 = vrot.slane %v520_v17, 1  ;;  %v531_v45 = vrot.slane %v523_v30, 1 }
 0x92b   :  { %v2447_v27 = vpack.c.bf16 %v2059_v37, %v2055_v63  ;;  %v2437_v32 = vpack.c.bf16 %v2058_v54, %v2054_v42  ;;  %v2445_v38 = vpack.c.bf16 %v2060_v19, %v2056_v15  ;;  %v1979_v35 = vsel %vm242_vm14, %v1970_v25, %v1972_v41 }
 0x92c   :  { %v2061_v59 = vmul.f32 %v2509_v12, %v1979_v35  ;;  %v530_v54 = vrot.slane %v522_v10, 1  ;;  %v529_v37 = vrot.slane %v521_v55, 1  ;;  %v536_v47 = vadd.f32 %v528_v57, %v520_v17 }
 0x92d   :  { %2438 = vmatprep.subr.bf16.mxu0 %v2437_v32  ;;  %2446 = vmatprep.subr.bf16.mxu1 %v2445_v38  ;;  %v539_v13 = vadd.f32 %v531_v45, %v523_v30  ;;  %v2597_v35 = vmov 1966171168  }
 0x92e   :  { %v1974_v52 = vpop.permute.xlu1 %1973  ;;  %2440 = vmatpush1.bf16.msra.mxu0 %v2439_v33  ;;  %2448 = vmatpush1.bf16.msra.mxu1 %v2447_v27  ;;  %v1976_v6 = vpop.permute.xlu0 %1975  ;;  %v538_v49 = vadd.f32 %v530_v54, %v522_v10  ;;  %v537_v19 = vadd.f32 %v529_v37, %v521_v55  ;;  %v541_v15 = vmul.f32 %v540_v46, %v536_v47 }
 0x92f   :  { %v1978_v34 = vsel %vm242_vm14, %v1972_v41, %v1974_v52  ;;  %v1977_v39 = vsel %vm242_vm14, %v1974_v52, %v1976_v6  ;;  %v1980_v43 = vsel %vm242_vm14, %v1976_v6, %v1970_v25  ;;  %v544_v27 = vmul.f32 %v540_v46, %v539_v13 }
 0x930   :  { %v2062_v23 = vmul.f32 %v2506_v36, %v1978_v34  ;;  %v2063_v58 = vmul.f32 %v2507_v62, %v1977_v39  ;;  %v2064_v50 = vmul.f32 %v2508_v0, %v1980_v43  ;;  %v543_v51 = vmul.f32 %v540_v46, %v538_v49  ;;  %v3888_v0 = vld [vmem:[#allocation14_spill] sm:$0xff] }
 0x931   :  { %v542_v25 = vmul.f32 %v540_v46, %v537_v19  ;;  %v546_v38 = vadd.f32 %v545_v26, %v541_v15  ;;  %v2278_v52 = vunpack.c.l.s4 %v2597_v35 }
 0x932   :  { %2351 = vmatprep.subr.msk.mxu0 %vm334_vm7, %v2062_v23  ;;  %2354 = vmatprep.subr.msk.mxu1 %vm334_vm7, %v2064_v50  ;;  %v548_v34 = vadd.f32 %v545_v26, %v543_v51 }
 0x933   :  { %2352 = vmatpush1.msk.msra.mxu0 %vm334_vm7, %v2061_v59  ;;  %2355 = vmatpush1.msk.msra.mxu1 %vm334_vm7, %v2063_v58  ;;  %v547_v36 = vadd.f32 %v545_v26, %v542_v25  ;;  %v549_v58 = vadd.f32 %v545_v26, %v544_v27 }
 0x934   :  { %2353 = vmatmul.mubr.msk.f32.vlgmr.msra.gmra.mrb[10].mxu0 %vm889_vm6, %v115_v14  ;;  %2356 = vmatmul.mubr.msk.f32.vlgmr.msra.gmra.mrb[10].mxu1 %vm889_vm6, %v115_v14 }
 0x93f   :  { %v2068_v29 = vpop.permute.xlu1 %2067 }
 0x940   :  { %v2073_v7 = vrot.slane %v2068_v29, %v3887_v31  ;;  %v2279_v29 = vunpack.c.0.s8 %v2278_v52 }
 0xa07   :  { %v2155_v21 = vpop.f32.mrb[10].mxu0  ;;  %v2226_v28 = vpop.f32.mrb[10].mxu1 }
 0xa08   :  { %v2156_v20 = vadd.f32 %v2155_v21, %v2073_v7  ;;  %v2227_v22 = vadd.f32 %v2226_v28, %v2073_v7  ;;  %v2157_v3 = vpop.f32.mrb[11].mxu0  ;;  %v2228_v40 = vpop.f32.mrb[11].mxu1 }
 0xa09   :  { %v2158_v63 = vadd.f32 %v2157_v3, %v2073_v7  ;;  %v2229_v18 = vadd.f32 %v2228_v40, %v2073_v7 }
 0xa0a   :  { %v2357_v53 = vmul.f32 -1.442695, %v2156_v20  ;;  %v2359_v61 = vmul.f32 -1.442695, %v2227_v22 }
 0xa0b   :  { %v2358_v1 = vmul.f32 -1.442695, %v2158_v63  ;;  %v2360_v4 = vmul.f32 -1.442695, %v2229_v18 }
 0xa0c   :  { %2474 = vpow2.f32 %v2357_v53 }
 0xa0d   :  { %2476 = vpow2.f32 %v2359_v61  ;;  %v3889_v61 = vlaneseq }
 0xa0e   :  { %2478 = vpow2.f32 %v2358_v1 }
 0xa0f   :  { %2480 = vpow2.f32 %v2360_v4  ;;  %vm2302_vm0 = vcmp.lt.s32.totalorder %v3889_v61, 512 }
 0xa16   :  { %v2475_v5 = vpop.eup %2474 }
 0xa17   :  { %v2477_v42 = vpop.eup %2476  ;;  %v2243_v56 = vadd.f32 1.0, %v2475_v5 }
 0xa18   :  { %v2479_v44 = vpop.eup %2478  ;;  %v2245_v24 = vadd.f32 1.0, %v2477_v42 }
 0xa19   :  { %v2481_v48 = vpop.eup %2480  ;;  %2482 = vrcp.f32 %v2243_v56  ;;  %v2244_v16 = vadd.f32 1.0, %v2479_v44 }
 0xa1a   :  { %2484 = vrcp.f32 %v2245_v24  ;;  %v2246_v60 = vadd.f32 1.0, %v2481_v48 }
 0xa1b   :  { %2486 = vrcp.f32 %v2244_v16 }
 0xa1c   :  { %2488 = vrcp.f32 %v2246_v60 }
 0xa23   :  { %v2483_v41 = vpop.eup %2482 }
 0xa24   :  { %v2485_v32 = vpop.eup %2484  ;;  %v2255_v33 = vadd.f32 %v2483_v41, %v2715_v9 }
 0xa25   :  { %v2487_v6 = vpop.eup %2486  ;;  %v2257_v39 = vadd.f32 %v2485_v32, %v2711_v8  ;;  %v2282_v8 = vsub.s32 %v2279_v29, %v2702_v2 }
 0xa26   :  { %v2489_v43 = vpop.eup %2488  ;;  %v2256_v23 = vadd.f32 %v2487_v6, %v2723_v11  ;;  %v2259_v62 = vadd.f32 %v2255_v33, %v546_v38 }
 0xa27   :  { %v2258_v50 = vadd.f32 %v2489_v43, %v3888_v0  ;;  %v2261_v12 = vadd.f32 %v2257_v39, %v548_v34 }
 0xa28   :  { %v2260_v59 = vadd.f32 %v2256_v23, %v547_v36  ;;  %v2263_v14 = vmax.f32 %v2259_v62, 0.0001 }
 0xa29   :  { %v2262_v31 = vadd.f32 %v2258_v50, %v549_v58  ;;  %v2265_v9 = vmax.f32 %v2261_v12, 0.0001 }
 0xa2a   :  { %v2264_v7 = vmax.f32 %v2260_v59, 0.0001  ;;  %v2267_v21 = vmin.f32 %v2263_v14, 1.0 }
 0xa2b   :  { %v2266_v28 = vmax.f32 %v2262_v31, 0.0001  ;;  %v2269_v20 = vmin.f32 %v2265_v9, 1.0 }
 0xa2c   :  { %v2268_v22 = vmin.f32 %v2264_v7, 1.0 }
 0xa2d   :  { %v2270_v3 = vmin.f32 %v2266_v28, 1.0 }
 0xa2e   :  { %v2275_v40 = vcombine.low %v2267_v21, %v2268_v22 }
 0xa2f   :  { %v2276_v11 = vcombine.low %v2269_v20, %v2270_v3 }
 0xa30   :  { %v2283_v63 = vrot.slane %v2275_v40, %v2282_v8 }
 0xa31   :  { %v2290_v18 = vrot.slane %v2276_v11, %v2282_v8 }
 0xa33   :  { %v2291_v53 = vcombine.low %v2283_v63, %v2290_v18 }
 0xa35   :  { %v2298_v1 = vrot.slane %v2291_v53, %v2282_v8 }
 0xa37   :  { %2304 = vst.msk [vmem:[#allocation10] sm:$0xf] %vm2302_vm0, %v2298_v1 }
 0xa38   :  { %2565 = shalt.err (!%p2562_p6)
}
 0xa39   :  { %s2566_s25 = scalar_lea.hbm %s3877_s14, 64 }
 0xa3a   :  { %p2567_p7 = scmp.ne.s32.totalorder %s3877_s14, %s2566_s25  ;;  %p2570_p8 = scmp.lt.u32.totalorder %s2566_s25, %s3877_s14 }
 0xa3c   :  { %p2572_p9 = pnand %p2570_p8, %p2567_p7 }
 0xa3e   :  { %2575 = shalt.err (!%p2572_p9)
}
 0xa3f   :  { %2314 = dma.vmem_to_hbm [thread:$0]  %s2312_s13, 64, %s3877_s14, [#allocation7]  }
 0xa40   :  { %2580 = dma.done.wait [#allocation7], 64  }
 0xa41   :  { %2581 = vsyncadd [#allocation7], 4294967232 }
 0xa42   :  { %2318 = vsyncpa [#allocation6], 1 }
 0xa43   :  { %2319 = vsyncpa [#allocation9], 1 }
 0xa44   :  { %2320 = vsyncpa [#allocation7], 1 }

</bundles_post_ra>
